<compile_context>
chip_gen: v7x
topology: tpu7x:2x2x1
jax: 0.10.0
libtpu: 0.0.40
codegen_flags: <defaults>
</compile_context>

<pallas_src>
import jax
import jax.numpy as jnp
from jax.experimental import pallas as pl
from jax.experimental.pallas import tpu as pltpu


def _round_up(n, m):
    return ((n + m - 1) // m) * m


def mlp_pe_kernel(x_ref, w1_ref, b1_ref, w2_ref, b2_ref, w3_ref, b3_ref, o_ref):
    # bf16 inputs to the MXU, f32 accumulation, f32 bias adds.
    # (astype is a no-op if the producer already supplies bf16 x.)
    x = x_ref[...].astype(jnp.bfloat16)                                    # (TB, 3072)
    # Layer 1: 3072 -> H1, ReLU.  PE is pre-folded into b1.
    h1 = jnp.dot(x, w1_ref[...], preferred_element_type=jnp.float32) + b1_ref[...]
    h1 = jnp.maximum(h1, 0.0).astype(jnp.bfloat16)
    # Layer 2: H1 -> H2, ReLU.
    h2 = jnp.dot(h1, w2_ref[...], preferred_element_type=jnp.float32) + b2_ref[...]
    h2 = jnp.maximum(h2, 0.0).astype(jnp.bfloat16)
    # Layer 3: H2 -> 128 (zero-padded from 100; no final ReLU, like PyTorch).
    o_ref[...] = jnp.dot(h2, w3_ref[...], preferred_element_type=jnp.float32) + b3_ref[...]


def prepare_params(pe, w1, b1, w2, b2, w3, b3):
    """One-time parameter prep (do NOT call per forward pass).

    Folds the positional embedding into the layer-1 bias, casts weights to
    bf16 for the MXU, and zero-pads the output dim to a lane-dense 128.
    Weights are stored (in, out) so the kernel computes x @ W + b
    (== PyTorch's x @ W.T + b with W of shape (out, in)).
    """
    D_in = pe.size
    pe_flat = pe.reshape(1, D_in).astype(jnp.float32)
    b1 = jnp.asarray(b1, jnp.float32).reshape(1, -1)
    b2 = jnp.asarray(b2, jnp.float32).reshape(1, -1)
    b3 = jnp.asarray(b3, jnp.float32).reshape(1, -1)

    # PE fold: exact rewrite of (x + pe) @ w1 + b1 == x @ w1 + (pe @ w1 + b1).
    b1_fold = pe_flat @ jnp.asarray(w1, jnp.float32) + b1                  # (1, H1), f32

    n_out = w3.shape[1]
    n_out_pad = _round_up(n_out, 128)
    w3_p = jnp.pad(jnp.asarray(w3, jnp.float32), ((0, 0), (0, n_out_pad - n_out)))
    b3_p = jnp.pad(b3, ((0, 0), (0, n_out_pad - n_out)))

    return dict(
        w1=jnp.asarray(w1).astype(jnp.bfloat16),
        b1=b1_fold,
        w2=jnp.asarray(w2).astype(jnp.bfloat16),
        b2=b2,
        w3=w3_p.astype(jnp.bfloat16),
        b3=b3_p,
        n_out=n_out,
        d_in=D_in,
    )


def mlp_with_pe(x, params, *, max_tile_b=1024, slice_output=True):
    """x: (B, 3, 32, 32) float32 (or bfloat16). Returns (B, 100) float32
    (or the padded (b_pad, 128) buffer if slice_output=False)."""
    B = x.shape[0]
    D_in = params["d_in"]
    n_out_pad = params["w3"].shape[1]
    x_flat = x.reshape(B, D_in)        # keep producer dtype; no standalone astype

    # Batch tiling: >= 2 grid steps when B is large enough (both v7x TCs get
    # work), 8-row granularity, capped at max_tile_b rows per tile.
    tile_b = min(_round_up(max(-(-B // 2), 1), 8), max_tile_b)
    b_pad = _round_up(B, tile_b)
    if b_pad != B:
        x_flat = jnp.pad(x_flat, ((0, b_pad - B), (0, 0)))
    grid = (b_pad // tile_b,)

    # Full-array blocks with constant index_map -> resident in VMEM.
    resident = lambda arr: pl.BlockSpec(arr.shape, lambda i: (0,) * arr.ndim)
    weights = (params["w1"], params["b1"], params["w2"],
               params["b2"], params["w3"], params["b3"])

    out = pl.pallas_call(
        mlp_pe_kernel,
        out_shape=jax.ShapeDtypeStruct((b_pad, n_out_pad), jnp.float32),
        grid=grid,
        in_specs=[pl.BlockSpec((tile_b, D_in), lambda i: (i, 0))]
                 + [resident(a) for a in weights],
        out_specs=pl.BlockSpec((tile_b, n_out_pad), lambda i: (i, 0)),
        compiler_params=pltpu.CompilerParams(
            dimension_semantics=("parallel",),
            vmem_limit_bytes=40 << 20,     # 1024x3072 f32 x-tiles, double-buffered
        ),
    )(x_flat, *weights)

    if slice_output:
        out = out[:B, :params["n_out"]]
    return out


def reference_f32(x, pe, w1, b1, w2, b2, w3, b3):
    """Pure-f32 PyTorch-semantics reference."""
    B = x.shape[0]
    h = x.reshape(B, -1) + pe.reshape(1, -1)
    h = jnp.maximum(h @ w1 + b1, 0.0)
    h = jnp.maximum(h @ w2 + b2, 0.0)
    return h @ w3 + b3


def reference_mixed(x, pe, w1, b1, w2, b2, w3, b3):
    """Reference using the same mixed-precision policy as the kernel:
    PE folded into b1 in f32, bf16 MXU inputs, f32 accumulation / bias adds."""
    B = x.shape[0]
    D_in = pe.size
    b1_fold = pe.reshape(1, D_in).astype(jnp.float32) @ w1 + b1
    h = x.reshape(B, D_in).astype(jnp.bfloat16)
    h = jnp.dot(h, w1.astype(jnp.bfloat16), preferred_element_type=jnp.float32) + b1_fold
    h = jnp.maximum(h, 0.0).astype(jnp.bfloat16)
    h = jnp.dot(h, w2.astype(jnp.bfloat16), preferred_element_type=jnp.float32) + b2
    h = jnp.maximum(h, 0.0).astype(jnp.bfloat16)
    return jnp.dot(h, w3.astype(jnp.bfloat16), preferred_element_type=jnp.float32) + b3


if __name__ == "__main__":
    # hidden_sizes = [256, 128]  ->  layer dims [3072, 256, 128, 100]
    D_in, H1, H2, D_out = 3 * 32 * 32, 256, 128, 100
    B = 8

    key = jax.random.PRNGKey(0)
    kx, kpe, k1, k2, k3, kb1, kb2, kb3 = jax.random.split(key, 8)

    x = jax.random.normal(kx, (B, 3, 32, 32), dtype=jnp.float32)
    # PE is zeros at init in the PyTorch module; small random values here so
    # the PE fold actually matters in the test.
    pe = 0.1 * jax.random.normal(kpe, (1, 3, 32, 32), dtype=jnp.float32)

    w1 = 0.02 * jax.random.normal(k1, (D_in, H1), dtype=jnp.float32)
    b1 = 0.01 * jax.random.normal(kb1, (1, H1), dtype=jnp.float32)
    w2 = 0.05 * jax.random.normal(k2, (H1, H2), dtype=jnp.float32)
    b2 = 0.01 * jax.random.normal(kb2, (1, H2), dtype=jnp.float32)
    w3 = 0.05 * jax.random.normal(k3, (H2, D_out), dtype=jnp.float32)
    b3 = 0.01 * jax.random.normal(kb3, (1, D_out), dtype=jnp.float32)

    # One-time parameter prep (PE fold, bf16 casts, 128-pad) — out of hot path.
    params = prepare_params(pe, w1, b1, w2, b2, w3, b3)

    out = mlp_with_pe(x, params)
    out = jax.block_until_ready(out)
    assert out.shape == (B, D_out)

    # Strict check vs a reference using the same mixed-precision policy.
    ref_m = reference_mixed(x, pe, w1, b1, w2, b2, w3, b3)
    assert jnp.allclose(out, ref_m, atol=2e-3, rtol=2e-3), \
        "mismatch vs mixed-precision reference"

    # Loose sanity check vs the pure-f32 module semantics (bounds bf16 drift).
    ref_f = reference_f32(x, pe, w1, b1, w2, b2, w3, b3)
    assert jnp.allclose(out, ref_f, atol=5e-2, rtol=5e-2), \
        "bf16 weights drifted too far from f32 reference"

    print("KERNEL_OK")
</pallas_src>

<mosaic_0001>
module attributes {stable_mosaic.version = 11 : i64} {
  func.func @mlp_pe_kernel(%arg0: i32, %arg1: memref<8x3072xf32, #tpu.memory_space<vmem>>, %arg2: memref<3072x256xbf16, #tpu.memory_space<vmem>>, %arg3: memref<1x256xf32, #tpu.memory_space<vmem>>, %arg4: memref<256x128xbf16, #tpu.memory_space<vmem>>, %arg5: memref<1x128xf32, #tpu.memory_space<vmem>>, %arg6: memref<128x128xbf16, #tpu.memory_space<vmem>>, %arg7: memref<1x128xf32, #tpu.memory_space<vmem>>, %arg8: memref<8x128xf32, #tpu.memory_space<vmem>>) attributes {dimension_semantics = [#tpu.dimension_semantics<parallel>], iteration_bounds = array<i64: 1>, scalar_prefetch = 0 : i64, scratch_operands = 0 : i64, tpu.core_type = #tpu.core_type<tc>, window_params = [{transform_indices = @transform_0, window_bounds = array<i64: 8, 3072>}, {pipeline_mode = #tpu.pipeline_mode<synchronous>, transform_indices = @transform_1, window_bounds = array<i64: 3072, 256>}, {pipeline_mode = #tpu.pipeline_mode<synchronous>, transform_indices = @transform_2, window_bounds = array<i64: 1, 256>}, {pipeline_mode = #tpu.pipeline_mode<synchronous>, transform_indices = @transform_3, window_bounds = array<i64: 256, 128>}, {pipeline_mode = #tpu.pipeline_mode<synchronous>, transform_indices = @transform_4, window_bounds = array<i64: 1, 128>}, {pipeline_mode = #tpu.pipeline_mode<synchronous>, transform_indices = @transform_5, window_bounds = array<i64: 128, 128>}, {pipeline_mode = #tpu.pipeline_mode<synchronous>, transform_indices = @transform_6, window_bounds = array<i64: 1, 128>}, {transform_indices = @transform_7, window_bounds = array<i64: 8, 128>}]} {
    %c0 = arith.constant 0 : index
    %c0_0 = arith.constant 0 : index
    %0 = vector.load %arg1[%c0, %c0_0] : memref<8x3072xf32, #tpu.memory_space<vmem>>, vector<8x3072xf32>
    %1 = arith.truncf %0 : vector<8x3072xf32> to vector<8x3072xbf16>
    %c0_1 = arith.constant 0 : index
    %c0_2 = arith.constant 0 : index
    %2 = vector.load %arg2[%c0_1, %c0_2] : memref<3072x256xbf16, #tpu.memory_space<vmem>>, vector<3072x256xbf16>
    %cst = arith.constant dense<0.000000e+00> : vector<8x256xf32>
    %3 = tpu.matmul %1, %2, %cst {dimension_numbers = #tpu.dot_dimension_numbers<[1], [0], [0], [1], [0, 0, 1, 1], [], []>} : vector<8x3072xbf16>, vector<3072x256xbf16>, vector<8x256xf32> -> vector<8x256xf32>
    %c0_3 = arith.constant 0 : index
    %c0_4 = arith.constant 0 : index
    %4 = vector.load %arg3[%c0_3, %c0_4] : memref<1x256xf32, #tpu.memory_space<vmem>>, vector<1x256xf32>
    %5 = vector.broadcast %4 : vector<1x256xf32> to vector<8x256xf32>
    %6 = arith.addf %3, %5 : vector<8x256xf32>
    %cst_5 = arith.constant 0.000000e+00 : f32
    %7 = vector.broadcast %cst_5 : f32 to vector<8x256xf32>
    %8 = arith.maximumf %6, %7 : vector<8x256xf32>
    %9 = arith.truncf %8 : vector<8x256xf32> to vector<8x256xbf16>
    %c0_6 = arith.constant 0 : index
    %c0_7 = arith.constant 0 : index
    %10 = vector.load %arg4[%c0_6, %c0_7] : memref<256x128xbf16, #tpu.memory_space<vmem>>, vector<256x128xbf16>
    %cst_8 = arith.constant dense<0.000000e+00> : vector<8x128xf32>
    %11 = tpu.matmul %9, %10, %cst_8 {dimension_numbers = #tpu.dot_dimension_numbers<[1], [0], [0], [1], [0, 0, 1, 1], [], []>} : vector<8x256xbf16>, vector<256x128xbf16>, vector<8x128xf32> -> vector<8x128xf32>
    %c0_9 = arith.constant 0 : index
    %c0_10 = arith.constant 0 : index
    %12 = vector.load %arg5[%c0_9, %c0_10] : memref<1x128xf32, #tpu.memory_space<vmem>>, vector<1x128xf32>
    %13 = vector.broadcast %12 : vector<1x128xf32> to vector<8x128xf32>
    %14 = arith.addf %11, %13 : vector<8x128xf32>
    %cst_11 = arith.constant 0.000000e+00 : f32
    %15 = vector.broadcast %cst_11 : f32 to vector<8x128xf32>
    %16 = arith.maximumf %14, %15 : vector<8x128xf32>
    %17 = arith.truncf %16 : vector<8x128xf32> to vector<8x128xbf16>
    %c0_12 = arith.constant 0 : index
    %c0_13 = arith.constant 0 : index
    %18 = vector.load %arg6[%c0_12, %c0_13] : memref<128x128xbf16, #tpu.memory_space<vmem>>, vector<128x128xbf16>
    %cst_14 = arith.constant dense<0.000000e+00> : vector<8x128xf32>
    %19 = tpu.matmul %17, %18, %cst_14 {dimension_numbers = #tpu.dot_dimension_numbers<[1], [0], [0], [1], [0, 0, 1, 1], [], []>} : vector<8x128xbf16>, vector<128x128xbf16>, vector<8x128xf32> -> vector<8x128xf32>
    %c0_15 = arith.constant 0 : index
    %c0_16 = arith.constant 0 : index
    %20 = vector.load %arg7[%c0_15, %c0_16] : memref<1x128xf32, #tpu.memory_space<vmem>>, vector<1x128xf32>
    %21 = vector.broadcast %20 : vector<1x128xf32> to vector<8x128xf32>
    %22 = arith.addf %19, %21 : vector<8x128xf32>
    %c0_17 = arith.constant 0 : index
    %c0_18 = arith.constant 0 : index
    %23 = vector.load %arg8[%c0_17, %c0_18] : memref<8x128xf32, #tpu.memory_space<vmem>>, vector<8x128xf32>
    tpu.vector_store %arg8[%c0_17, %c0_18], %22 {strides = array<i32>} : memref<8x128xf32, #tpu.memory_space<vmem>>, vector<8x128xf32>,
    return
  }
  func.func @transform_0(%arg0: i32) -> (i32, i32) {
    %c0_i32 = arith.constant 0 : i32
    %c0_i32_0 = arith.constant 0 : i32
    return %arg0, %c0_i32 : i32, i32
  }
  func.func @transform_1(%arg0: i32) -> (i32, i32) {
    %c0_i32 = arith.constant 0 : i32
    %c0_i32_0 = arith.constant 0 : i32
    %c0_i32_1 = arith.constant 0 : i32
    return %c0_i32, %c0_i32_0 : i32, i32
  }
  func.func @transform_2(%arg0: i32) -> (i32, i32) {
    %c0_i32 = arith.constant 0 : i32
    %c0_i32_0 = arith.constant 0 : i32
    %c0_i32_1 = arith.constant 0 : i32
    return %c0_i32, %c0_i32_0 : i32, i32
  }
  func.func @transform_3(%arg0: i32) -> (i32, i32) {
    %c0_i32 = arith.constant 0 : i32
    %c0_i32_0 = arith.constant 0 : i32
    %c0_i32_1 = arith.constant 0 : i32
    return %c0_i32, %c0_i32_0 : i32, i32
  }
  func.func @transform_4(%arg0: i32) -> (i32, i32) {
    %c0_i32 = arith.constant 0 : i32
    %c0_i32_0 = arith.constant 0 : i32
    %c0_i32_1 = arith.constant 0 : i32
    return %c0_i32, %c0_i32_0 : i32, i32
  }
  func.func @transform_5(%arg0: i32) -> (i32, i32) {
    %c0_i32 = arith.constant 0 : i32
    %c0_i32_0 = arith.constant 0 : i32
    %c0_i32_1 = arith.constant 0 : i32
    return %c0_i32, %c0_i32_0 : i32, i32
  }
  func.func @transform_6(%arg0: i32) -> (i32, i32) {
    %c0_i32 = arith.constant 0 : i32
    %c0_i32_0 = arith.constant 0 : i32
    %c0_i32_1 = arith.constant 0 : i32
    return %c0_i32, %c0_i32_0 : i32, i32
  }
  func.func @transform_7(%arg0: i32) -> (i32, i32) {
    %c0_i32 = arith.constant 0 : i32
    %c0_i32_0 = arith.constant 0 : i32
    return %arg0, %c0_i32 : i32, i32
  }
}

</mosaic_0001>

<bundles_post_ra>
// kernel: tpu_custom_call.1
= control target key start
LH: loop header
LB: loop body
LE: loop exit
PB: predicated region body
PF: predicated region fallthrough
CT: control target
= control target key end

     0   :  { %12 = vsyncpa [#allocation3], 0  ;;  %s4737_s0 = inlined_call_operand.hbm [shape: f32[8,3072], index: 0, kind: input, shape index: {}]   ;;  %s4738_s1 = inlined_call_operand.hbm [shape: bf16[3072,256], index: 1, kind: input, shape index: {}]   ;;  %s4739_s2 = inlined_call_operand.hbm [shape: f32[1,256], index: 2, kind: input, shape index: {}]   ;;  %s4740_s3 = inlined_call_operand.hbm [shape: bf16[256,128], index: 3, kind: input, shape index: {}]   ;;  %s4741_s4 = inlined_call_operand.hbm [shape: f32[1,128], index: 4, kind: input, shape index: {}]   ;;  %s4742_s5 = inlined_call_operand.hbm [shape: bf16[128,128], index: 5, kind: input, shape index: {}]   ;;  %s4743_s6 = inlined_call_operand.hbm [shape: f32[1,128], index: 6, kind: input, shape index: {}]   ;;  %s4744_s7 = inlined_call_operand.hbm [shape: f32[8,128], index: 7, kind: output, shape index: {}]  }
   0x1   :  { %13 = vsyncpa [#allocation6], 0 }
   0x2   :  { %14 = vsyncpa [#allocation9], 0 }
   0x3   :  { %15 = vsyncpa [#allocation12], 0 }
   0x4   :  { %16 = vsyncpa [#allocation4], 0  ;;  %s4587_s24 = smov [#allocation5]   ;;  %s4401_s28 = scalar_lea.hbm %s4738_s1, 49152 }
   0x5   :  { %s32_s25 = sshll.u32 %s4587_s24, 4  ;;  %p4402_p0 = scmp.ne.s32.totalorder %s4738_s1, %s4401_s28  ;;  %s33_s25 = int_to_ptr.vmem [resolvable:$true] %s32_s25 }
   0x6   :  { %p4405_p1 = scmp.lt.u32.totalorder %s4401_s28, %s4738_s1 }
   0x8   :  { %p4407_p2 = pnand %p4405_p1, %p4402_p0 }
   0xa   :  { %4410 = shalt.err (!%p4407_p2)
}
   0xb   :  { %s4411_s10 = scalar_lea.vmem %s33_s25, 49152  ;;  %p4416_p4 = scmp.lt.s32.totalorder %s33_s25, %s33_s25 }
   0xc   :  { %p4412_p3 = scmp.ne.s32.totalorder %s33_s25, %s4411_s10  ;;  %p4417_p5 = scmp.lt.s32.totalorder %s4411_s10, %s4411_s10 }
   0xe   :  { %p4418_p6 = por %p4417_p5, %p4416_p4 }
  0x10   :  { %p4419_p7 = pnand %p4418_p6, %p4412_p3 }
  0x12   :  { %4422 = shalt.err (!%p4419_p7)
}
  0x13   :  { %s4588_s11 = smov 128   ;;  %s4589_s12 = smov 8  }
  0x14   :  { %38 = dma.hbm_to_vmem [thread:$0]  %s4738_s1, 49152, %s33_s25, [#allocation6], %s4588_s11, %s4588_s11, %s4589_s12  }
  0x15   :  { %s4590_s15 = smov [#allocation8]   ;;  %s4423_s19 = scalar_lea.hbm %s4740_s3, 2048 }
  0x16   :  { %s54_s16 = sshll.u32 %s4590_s15, 4  ;;  %p4424_p8 = scmp.ne.s32.totalorder %s4740_s3, %s4423_s19  ;;  %s55_s16 = int_to_ptr.vmem [resolvable:$true] %s54_s16 }
  0x17   :  { %p4427_p9 = scmp.lt.u32.totalorder %s4423_s19, %s4740_s3 }
  0x19   :  { %p4429_p10 = pnand %p4427_p9, %p4424_p8 }
  0x1b   :  { %4432 = shalt.err (!%p4429_p10)
}
  0x1c   :  { %s4433_s24 = scalar_lea.vmem %s55_s16, 2048  ;;  %p4438_p12 = scmp.lt.s32.totalorder %s55_s16, %s55_s16 }
  0x1d   :  { %p4434_p11 = scmp.ne.s32.totalorder %s55_s16, %s4433_s24  ;;  %p4439_p13 = scmp.lt.s32.totalorder %s4433_s24, %s4433_s24 }
  0x1f   :  { %p4440_p0 = por %p4439_p13, %p4438_p12 }
  0x21   :  { %p4441_p1 = pnand %p4440_p0, %p4434_p11 }
  0x23   :  { %4444 = shalt.err (!%p4441_p1)
}
  0x24   :  { %s4591_s1 = smov 64   ;;  %s4592_s25 = smov 4  }
  0x25   :  { %60 = dma.hbm_to_vmem [thread:$0]  %s4740_s3, 2048, %s55_s16, [#allocation9], %s4591_s1, %s4591_s1, %s4592_s25  }
  0x26   :  { %s4593_s28 = smov [#allocation11]   ;;  %s4594_s30 = smov [#allocation2]  }
  0x27   :  { %s76_s29 = sshll.u32 %s4593_s28, 4  ;;  %s23_s8 = sshll.u32 %s4594_s30, 4  ;;  %s77_s29 = int_to_ptr.vmem [resolvable:$true] %s76_s29  ;;  %s24_s8 = int_to_ptr.vmem [resolvable:$true] %s23_s8 }
  0x28   :  { %s4445_s11 = scalar_lea.hbm %s4742_s5, 1024 }
  0x29   :  { %p4446_p2 = scmp.ne.s32.totalorder %s4742_s5, %s4445_s11  ;;  %p4449_p3 = scmp.lt.u32.totalorder %s4445_s11, %s4742_s5 }
  0x2b   :  { %p4451_p4 = pnand %p4449_p3, %p4446_p2 }
  0x2d   :  { %4454 = shalt.err (!%p4451_p4)
}
  0x2e   :  { %s4455_s3 = scalar_lea.vmem %s77_s29, 1024  ;;  %p4460_p6 = scmp.lt.s32.totalorder %s77_s29, %s77_s29 }
  0x2f   :  { %p4456_p5 = scmp.ne.s32.totalorder %s77_s29, %s4455_s3  ;;  %p4461_p7 = scmp.lt.s32.totalorder %s4455_s3, %s4455_s3 }
  0x31   :  { %p4462_p8 = por %p4461_p7, %p4460_p6 }
  0x33   :  { %p4463_p9 = pnand %p4462_p8, %p4456_p5 }
  0x35   :  { %4466 = shalt.err (!%p4463_p9)
}
  0x36   :  { %82 = dma.hbm_to_vmem [thread:$0]  %s4742_s5, 1024, %s77_s29, [#allocation12], %s4591_s1, %s4591_s1, %s4592_s25  }
  0x37   :  { %s4467_s20 = scalar_lea.hbm %s4737_s0, 3072 }
  0x38   :  { %p4468_p10 = scmp.ne.s32.totalorder %s4737_s0, %s4467_s20  ;;  %p4471_p11 = scmp.lt.u32.totalorder %s4467_s20, %s4737_s0 }
  0x3a   :  { %p4473_p12 = pnand %p4471_p11, %p4468_p10 }
  0x3c   :  { %4476 = shalt.err (!%p4473_p12)
}
  0x3d   :  { %s4477_s26 = scalar_lea.vmem %s24_s8, 3072  ;;  %p4482_p0 = scmp.lt.s32.totalorder %s24_s8, %s24_s8 }
  0x3e   :  { %p4478_p13 = scmp.ne.s32.totalorder %s24_s8, %s4477_s26  ;;  %p4483_p1 = scmp.lt.s32.totalorder %s4477_s26, %s4477_s26 }
  0x40   :  { %p4484_p2 = por %p4483_p1, %p4482_p0 }
  0x42   :  { %p4485_p3 = pnand %p4484_p2, %p4478_p13 }
  0x44   :  { %4488 = shalt.err (!%p4485_p3)
}
  0x45   :  { %26 = dma.hbm_to_vmem [thread:$0]  %s4737_s0, 3072, %s24_s8, [#allocation3]  }
  0x46   :  { %s4595_s25 = smov [#allocation7]   ;;  %s4596_s28 = smov [#allocation10]  }
  0x47   :  { %s45_s27 = sshll.u32 %s4595_s25, 4  ;;  %s67_s29 = sshll.u32 %s4596_s28, 4  ;;  %s46_s27 = int_to_ptr.vmem [resolvable:$true] %s45_s27  ;;  %s68_s29 = int_to_ptr.vmem [resolvable:$true] %s67_s29 }
  0x48   :  { %s4489_s10 = scalar_lea.hbm %s4739_s2, 32 }
  0x49   :  { %p4490_p4 = scmp.ne.s32.totalorder %s4739_s2, %s4489_s10  ;;  %p4493_p5 = scmp.lt.u32.totalorder %s4489_s10, %s4739_s2 }
  0x4b   :  { %p4495_p6 = pnand %p4493_p5, %p4490_p4 }
  0x4d   :  { %4498 = shalt.err (!%p4495_p6)
}
  0x4e   :  { %s4499_s0 = scalar_lea.vmem %s46_s27, 32  ;;  %p4504_p8 = scmp.lt.s32.totalorder %s46_s27, %s46_s27 }
  0x4f   :  { %p4500_p7 = scmp.ne.s32.totalorder %s46_s27, %s4499_s0  ;;  %p4505_p9 = scmp.lt.s32.totalorder %s4499_s0, %s4499_s0 }
  0x51   :  { %p4506_p10 = por %p4505_p9, %p4504_p8 }
  0x53   :  { %p4507_p11 = pnand %p4506_p10, %p4500_p7 }
  0x55   :  { %4510 = shalt.err (!%p4507_p11)
}
  0x56   :  { %48 = dma.hbm_to_vmem [thread:$0]  %s4739_s2, 32, %s46_s27, [#allocation6]  }
  0x57   :  { %s4511_s17 = scalar_lea.hbm %s4741_s4, 16 }
  0x58   :  { %p4512_p12 = scmp.ne.s32.totalorder %s4741_s4, %s4511_s17  ;;  %p4515_p13 = scmp.lt.u32.totalorder %s4511_s17, %s4741_s4 }
  0x5a   :  { %p4517_p0 = pnand %p4515_p13, %p4512_p12 }
  0x5c   :  { %4520 = shalt.err (!%p4517_p0)
}
  0x5d   :  { %s4521_s22 = scalar_lea.vmem %s68_s29, 16  ;;  %s4525_s23 = scalar_lea.vmem %s68_s29, 32 }
  0x5e   :  { %p4522_p1 = scmp.ne.s32.totalorder %s68_s29, %s4521_s22  ;;  %p4526_p2 = scmp.lt.s32.totalorder %s68_s29, %s68_s29 }
  0x5f   :  { %p4527_p3 = scmp.lt.s32.totalorder %s4525_s23, %s4521_s22 }
  0x61   :  { %p4528_p4 = por %p4527_p3, %p4526_p2 }
  0x63   :  { %p4529_p5 = pnand %p4528_p4, %p4522_p1 }
  0x65   :  { %4532 = shalt.err (!%p4529_p5)
}
  0x66   :  { %70 = dma.hbm_to_vmem [thread:$0]  %s4741_s4, 16, %s68_s29, [#allocation9]  }
  0x67   :  { %s4597_s26 = smov [#allocation13]   ;;  %s4533_s27 = scalar_lea.hbm %s4743_s6, 16 }
  0x68   :  { %s89_s5 = sshll.u32 %s4597_s26, 4  ;;  %p4534_p6 = scmp.ne.s32.totalorder %s4743_s6, %s4533_s27  ;;  %s90_s5 = int_to_ptr.vmem [resolvable:$true] %s89_s5 }
  0x69   :  { %p4537_p7 = scmp.lt.u32.totalorder %s4533_s27, %s4743_s6 }
  0x6b   :  { %p4539_p8 = pnand %p4537_p7, %p4534_p6 }
  0x6d   :  { %4542 = shalt.err (!%p4539_p8)
}
  0x6e   :  { %s4543_s11 = scalar_lea.vmem %s90_s5, 16  ;;  %s4547_s4 = scalar_lea.vmem %s90_s5, 32 }
  0x6f   :  { %p4544_p9 = scmp.ne.s32.totalorder %s90_s5, %s4543_s11  ;;  %p4548_p10 = scmp.lt.s32.totalorder %s90_s5, %s90_s5 }
  0x70   :  { %p4549_p11 = scmp.lt.s32.totalorder %s4547_s4, %s4543_s11 }
  0x72   :  { %p4550_p12 = por %p4549_p11, %p4548_p10 }
  0x74   :  { %p4551_p13 = pnand %p4550_p12, %p4544_p9 }
  0x76   :  { %4554 = shalt.err (!%p4551_p13)
}
  0x77   :  { %92 = dma.hbm_to_vmem [thread:$0]  %s4743_s6, 16, %s90_s5, [#allocation12]  }
  0x78   :  { %4577 = dma.done.wait [#allocation3], 3072  }
  0x79   :  { %4578 = vsyncadd [#allocation3], 4294964224 }
  0x7a   :  { %4579 = dma.done.wait [#allocation6], 49184  }
  0x7b   :  { %4580 = vsyncadd [#allocation6], 4294918112 }
  0x7c   :  { %4581 = dma.done.wait [#allocation9], 2064  }
  0x7d   :  { %4582 = vsyncadd [#allocation9], 4294965232 }
  0x7e   :  { %4583 = dma.done.wait [#allocation12], 1040  }
  0x7f   :  { %4584 = vsyncadd [#allocation12], 4294966256  ;;  %v3801_v0 = vld [vmem:[#allocation5 + $0x4] ss:$8 sps:$4 sm:$0xff]   ;;  %v3805_v2 = vld [vmem:[#allocation5] ss:$8 sps:$4 sm:$0xff]  }
  0x80   :  { %v3803_v1 = vld [vmem:[#allocation5 + $0x504] ss:$8 sps:$4 sm:$0xff]   ;;  %2479 = vmatprep.subr.bf16.mxu1 %v3801_v0  ;;  %v3806_v3 = vld [vmem:[#allocation5 + $0x500] ss:$8 sps:$4 sm:$0xff]   ;;  %v3807_v4 = vld [vmem:[#allocation5 + $0x14] ss:$8 sps:$4 sm:$0xff]  }
  0x81   :  { %2684 = vmatprep.subr.bf16.mxu0 %v3803_v1  ;;  %2480 = vmatpush1.bf16.msra.mxu1 %v3805_v2  ;;  %v3809_v5 = vld [vmem:[#allocation5 + $0x514] ss:$8 sps:$4 sm:$0xff]   ;;  %v3811_v6 = vld [vmem:[#allocation5 + $0x10] ss:$8 sps:$4 sm:$0xff]   ;;  %v3813_v8 = vld [vmem:[#allocation5 + $0x24] ss:$8 sps:$4 sm:$0xff]  }
  0x82   :  { %2685 = vmatpush1.bf16.msra.mxu0 %v3806_v3  ;;  %2481 = vmatprep.subr.bf16.mxu1 %v3807_v4  ;;  %v3812_v7 = vld [vmem:[#allocation5 + $0x510] ss:$8 sps:$4 sm:$0xff]   ;;  %v3815_v9 = vld [vmem:[#allocation5 + $0x524] ss:$8 sps:$4 sm:$0xff]   ;;  %v3817_v10 = vld [vmem:[#allocation5 + $0x20] ss:$8 sps:$4 sm:$0xff]  }
  0x83   :  { %2686 = vmatprep.subr.bf16.mxu0 %v3809_v5  ;;  %v3818_v11 = vld [vmem:[#allocation5 + $0x520] ss:$8 sps:$4 sm:$0xff]   ;;  %v3819_v12 = vld [vmem:[#allocation5 + $0x34] ss:$8 sps:$4 sm:$0xff]   ;;  %v3823_v14 = vld [vmem:[#allocation5 + $0x30] ss:$8 sps:$4 sm:$0xff]  }
  0x84   :  { %v3821_v13 = vld [vmem:[#allocation5 + $0x534] ss:$8 sps:$4 sm:$0xff]   ;;  %v3824_v15 = vld [vmem:[#allocation5 + $0x530] ss:$8 sps:$4 sm:$0xff]   ;;  %v3825_v16 = vld [vmem:[#allocation5 + $0x44] ss:$8 sps:$4 sm:$0xff]  }
  0x85   :  { %2482 = vmatpush1.bf16.msra.mxu1 %v3811_v6  ;;  %v3827_v17 = vld [vmem:[#allocation5 + $0x544] ss:$8 sps:$4 sm:$0xff]   ;;  %v3829_v18 = vld [vmem:[#allocation5 + $0x40] ss:$8 sps:$4 sm:$0xff]   ;;  %v3831_v20 = vld [vmem:[#allocation5 + $0x54] ss:$8 sps:$4 sm:$0xff]  }
  0x86   :  { %2687 = vmatpush1.bf16.msra.mxu0 %v3812_v7  ;;  %2483 = vmatprep.subr.bf16.mxu1 %v3813_v8  ;;  %v3830_v19 = vld [vmem:[#allocation5 + $0x540] ss:$8 sps:$4 sm:$0xff]   ;;  %v3833_v21 = vld [vmem:[#allocation5 + $0x554] ss:$8 sps:$4 sm:$0xff]   ;;  %v3835_v22 = vld [vmem:[#allocation5 + $0x50] ss:$8 sps:$4 sm:$0xff]  }
  0x87   :  { %2688 = vmatprep.subr.bf16.mxu0 %v3815_v9  ;;  %v3836_v23 = vld [vmem:[#allocation5 + $0x550] ss:$8 sps:$4 sm:$0xff]   ;;  %v3837_v24 = vld [vmem:[#allocation5 + $0x64] ss:$8 sps:$4 sm:$0xff]   ;;  %v3841_v26 = vld [vmem:[#allocation5 + $0x60] ss:$8 sps:$4 sm:$0xff]  }
  0x88   :  { %v3839_v25 = vld [vmem:[#allocation5 + $0x564] ss:$8 sps:$4 sm:$0xff]   ;;  %v3842_v27 = vld [vmem:[#allocation5 + $0x560] ss:$8 sps:$4 sm:$0xff]   ;;  %v3843_v28 = vld [vmem:[#allocation5 + $0x74] ss:$8 sps:$4 sm:$0xff]  }
  0x89   :  { %2484 = vmatpush1.bf16.msra.mxu1 %v3817_v10  ;;  %v3845_v29 = vld [vmem:[#allocation5 + $0x574] ss:$8 sps:$4 sm:$0xff]   ;;  %v3847_v30 = vld [vmem:[#allocation5 + $0x70] ss:$8 sps:$4 sm:$0xff]   ;;  %v3849_v32 = vld [vmem:[#allocation5 + $0x84] ss:$8 sps:$4 sm:$0xff]  }
  0x8a   :  { %2689 = vmatpush1.bf16.msra.mxu0 %v3818_v11  ;;  %2485 = vmatprep.subr.bf16.mxu1 %v3819_v12  ;;  %v3848_v31 = vld [vmem:[#allocation5 + $0x570] ss:$8 sps:$4 sm:$0xff]   ;;  %v3851_v33 = vld [vmem:[#allocation5 + $0x584] ss:$8 sps:$4 sm:$0xff]   ;;  %v3853_v34 = vld [vmem:[#allocation5 + $0x80] ss:$8 sps:$4 sm:$0xff]  }
  0x8b   :  { %2690 = vmatprep.subr.bf16.mxu0 %v3821_v13  ;;  %v3854_v35 = vld [vmem:[#allocation5 + $0x580] ss:$8 sps:$4 sm:$0xff]   ;;  %v3855_v36 = vld [vmem:[#allocation5 + $0x94] ss:$8 sps:$4 sm:$0xff]   ;;  %v3859_v38 = vld [vmem:[#allocation5 + $0x90] ss:$8 sps:$4 sm:$0xff]  }
  0x8c   :  { %v3857_v37 = vld [vmem:[#allocation5 + $0x594] ss:$8 sps:$4 sm:$0xff]   ;;  %v3860_v39 = vld [vmem:[#allocation5 + $0x590] ss:$8 sps:$4 sm:$0xff]   ;;  %v3861_v40 = vld [vmem:[#allocation5 + $0xa4] ss:$8 sps:$4 sm:$0xff]  }
  0x8d   :  { %2486 = vmatpush1.bf16.msra.mxu1 %v3823_v14  ;;  %v3863_v41 = vld [vmem:[#allocation5 + $0x5a4] ss:$8 sps:$4 sm:$0xff]   ;;  %v3865_v42 = vld [vmem:[#allocation5 + $0xa0] ss:$8 sps:$4 sm:$0xff]   ;;  %v3867_v44 = vld [vmem:[#allocation5 + $0xb4] ss:$8 sps:$4 sm:$0xff]  }
  0x8e   :  { %2691 = vmatpush1.bf16.msra.mxu0 %v3824_v15  ;;  %2487 = vmatprep.subr.bf16.mxu1 %v3825_v16  ;;  %v3866_v43 = vld [vmem:[#allocation5 + $0x5a0] ss:$8 sps:$4 sm:$0xff]   ;;  %v3869_v45 = vld [vmem:[#allocation5 + $0x5b4] ss:$8 sps:$4 sm:$0xff]   ;;  %v3871_v47 = vld [vmem:[#allocation5 + $0xb0] ss:$8 sps:$4 sm:$0xff]  }
  0x8f   :  { %2692 = vmatprep.subr.bf16.mxu0 %v3827_v17  ;;  %v116_v46 = vld [vmem:[#allocation2 + $0x8] sm:$0xff]  ;;  %v3872_v49 = vld [vmem:[#allocation5 + $0x5b0] ss:$8 sps:$4 sm:$0xff]   ;;  %v3879_v56 = vld [vmem:[#allocation5 + $0xd4] ss:$8 sps:$4 sm:$0xff]   ;;  %vm4599_vm0 = vmmov 0  }
  0x90   :  { %v140_v48 = vpack.c.bf16 %v116_v46, %v116_v46  ;;  %v126_v50 = vld [vmem:[#allocation2 + $0x58] sm:$0xff]  ;;  %v3873_v51 = vld [vmem:[#allocation5 + $0xc4] ss:$8 sps:$4 sm:$0xff]   ;;  %v3877_v54 = vld [vmem:[#allocation5 + $0xc0] ss:$8 sps:$4 sm:$0xff]   ;;  %s4600_s6 = smov [#allocation14]  }
  0x91   :  { %2488 = vmatpush1.bf16.msra.mxu1 %v3829_v18  ;;  %v3875_v52 = vld [vmem:[#allocation5 + $0x5c4] ss:$8 sps:$4 sm:$0xff]   ;;  %v150_v53 = vpack.c.bf16 %v126_v50, %v126_v50  ;;  %v3878_v55 = vld [vmem:[#allocation5 + $0x5c0] ss:$8 sps:$4 sm:$0xff]   ;;  %v3881_v57 = vld [vmem:[#allocation5 + $0x5d4] ss:$8 sps:$4 sm:$0xff]  }
  0x92   :  { %2693 = vmatpush1.bf16.msra.mxu0 %v3830_v19  ;;  %2489 = vmatprep.subr.bf16.mxu1 %v3831_v20  ;;  %v3883_v58 = vld [vmem:[#allocation5 + $0xd0] ss:$8 sps:$4 sm:$0xff]   ;;  %v3885_v60 = vld [vmem:[#allocation5 + $0xe4] ss:$8 sps:$4 sm:$0xff]   ;;  %v3889_v62 = vld [vmem:[#allocation5 + $0xe0] ss:$8 sps:$4 sm:$0xff]  }
  0x93   :  { %2694 = vmatprep.subr.bf16.mxu0 %v3833_v21  ;;  %2511 = vmatprep.mubr.bf16.mxu1 %v140_v48  ;;  %v3884_v59 = vld [vmem:[#allocation5 + $0x5d0] ss:$8 sps:$4 sm:$0xff]   ;;  %v3887_v61 = vld [vmem:[#allocation5 + $0x5e4] ss:$8 sps:$4 sm:$0xff]   ;;  %v3890_v63 = vld [vmem:[#allocation5 + $0x5e0] ss:$8 sps:$4 sm:$0xff]  }
  0x94   :  { %2716 = vmatprep.mubr.bf16.mxu0 %v150_v53  ;;  %v3891_v0 = vld [vmem:[#allocation5 + $0xf4] ss:$8 sps:$4 sm:$0xff]   ;;  %v3895_v2 = vld [vmem:[#allocation5 + $0xf0] ss:$8 sps:$4 sm:$0xff]   ;;  %v3899_v4 = vld [vmem:[#allocation5 + $0x104] ss:$8 sps:$4 sm:$0xff]  }
  0x95   :  { %2490 = vmatpush1.bf16.msra.mxu1 %v3835_v22  ;;  %v3893_v1 = vld [vmem:[#allocation5 + $0x5f4] ss:$8 sps:$4 sm:$0xff]   ;;  %v3896_v3 = vld [vmem:[#allocation5 + $0x5f0] ss:$8 sps:$4 sm:$0xff]   ;;  %v115_v5 = vld [vmem:[#allocation2] sm:$0xff]  ;;  %s3270_s13 = sshll.u32 %s4600_s6, 4  ;;  %s3271_s13 = int_to_ptr.vmem [resolvable:$true] %s3270_s13 }
  0x96   :  { %2695 = vmatpush1.bf16.msra.mxu0 %v3836_v23  ;;  %2491 = vmatprep.subr.bf16.mxu1 %v3837_v24  ;;  %v125_v6 = vld [vmem:[#allocation2 + $0x50] sm:$0xff]  ;;  %v3902_v7 = vld [vmem:[#allocation5 + $0x604] ss:$8 sps:$4 sm:$0xff]   ;;  %v3897_v8 = vld [vmem:[#allocation5 + $0x100] ss:$8 sps:$4 sm:$0xff]   ;;  %v139_v10 = vpack.c.bf16 %v115_v5, %v115_v5  ;;  %s4555_s14 = scalar_lea.vmem %s3271_s13, 128  ;;  %p4560_p1 = scmp.lt.s32.totalorder %s3271_s13, %s3271_s13 }
  0x97   :  { %2696 = vmatprep.subr.bf16.mxu0 %v3839_v25  ;;  %v3900_v9 = vld [vmem:[#allocation5 + $0x600] ss:$8 sps:$4 sm:$0xff]   ;;  %v149_v11 = vpack.c.bf16 %v125_v6, %v125_v6  ;;  %v3905_v12 = vld [vmem:[#allocation5 + $0x114] ss:$8 sps:$4 sm:$0xff]   ;;  %v3903_v14 = vld [vmem:[#allocation5 + $0x110] ss:$8 sps:$4 sm:$0xff]   ;;  %p4556_p0 = scmp.ne.s32.totalorder %s3271_s13, %s4555_s14  ;;  %p4561_p2 = scmp.lt.s32.totalorder %s4555_s14, %s4555_s14 }
  0x98   :  { %v3908_v13 = vld [vmem:[#allocation5 + $0x614] ss:$8 sps:$4 sm:$0xff]   ;;  %v3906_v15 = vld [vmem:[#allocation5 + $0x610] ss:$8 sps:$4 sm:$0xff]   ;;  %v3911_v16 = vld [vmem:[#allocation5 + $0x124] ss:$8 sps:$4 sm:$0xff]  }
  0x99   :  { %2492 = vmatpush1.bf16.msra.mxu1 %v3841_v26  ;;  %v3914_v17 = vld [vmem:[#allocation5 + $0x624] ss:$8 sps:$4 sm:$0xff]   ;;  %v3909_v18 = vld [vmem:[#allocation5 + $0x120] ss:$8 sps:$4 sm:$0xff]   ;;  %v3917_v20 = vld [vmem:[#allocation5 + $0x134] ss:$8 sps:$4 sm:$0xff]   ;;  %p4562_p3 = por %p4561_p2, %p4560_p1 }
  0x9a   :  { %2697 = vmatpush1.bf16.msra.mxu0 %v3842_v27  ;;  %2493 = vmatprep.subr.bf16.mxu1 %v3843_v28  ;;  %v3912_v19 = vld [vmem:[#allocation5 + $0x620] ss:$8 sps:$4 sm:$0xff]   ;;  %v3920_v21 = vld [vmem:[#allocation5 + $0x634] ss:$8 sps:$4 sm:$0xff]   ;;  %v3915_v22 = vld [vmem:[#allocation5 + $0x130] ss:$8 sps:$4 sm:$0xff]  }
  0x9b   :  { %2698 = vmatprep.subr.bf16.mxu0 %v3845_v29  ;;  %v3918_v23 = vld [vmem:[#allocation5 + $0x630] ss:$8 sps:$4 sm:$0xff]   ;;  %v3923_v24 = vld [vmem:[#allocation5 + $0x144] ss:$8 sps:$4 sm:$0xff]   ;;  %v3921_v26 = vld [vmem:[#allocation5 + $0x140] ss:$8 sps:$4 sm:$0xff]   ;;  %p4563_p4 = pnand %p4562_p3, %p4556_p0 }
  0x9c   :  { %v3926_v25 = vld [vmem:[#allocation5 + $0x644] ss:$8 sps:$4 sm:$0xff]   ;;  %v3924_v27 = vld [vmem:[#allocation5 + $0x640] ss:$8 sps:$4 sm:$0xff]   ;;  %v3929_v28 = vld [vmem:[#allocation5 + $0x154] ss:$8 sps:$4 sm:$0xff]  }
  0x9d   :  { %2494 = vmatpush1.bf16.msra.mxu1 %v3847_v30  ;;  %v3932_v29 = vld [vmem:[#allocation5 + $0x654] ss:$8 sps:$4 sm:$0xff]   ;;  %v3927_v30 = vld [vmem:[#allocation5 + $0x150] ss:$8 sps:$4 sm:$0xff]   ;;  %v3945_v46 = vld [vmem:[#allocation5 + $0x180] ss:$8 sps:$4 sm:$0xff]  }
  0x9e   :  { %2699 = vmatpush1.bf16.msra.mxu0 %v3848_v31  ;;  %2495 = vmatprep.subr.bf16.mxu1 %v3849_v32  ;;  %v3930_v31 = vld [vmem:[#allocation5 + $0x650] ss:$8 sps:$4 sm:$0xff]   ;;  %v3935_v32 = vld [vmem:[#allocation5 + $0x164] ss:$8 sps:$4 sm:$0xff]   ;;  %v3953_v48 = vld [vmem:[#allocation5 + $0x194] ss:$8 sps:$4 sm:$0xff]  }
  0x9f   :  { %2700 = vmatprep.subr.bf16.mxu0 %v3851_v33  ;;  %v3938_v33 = vld [vmem:[#allocation5 + $0x664] ss:$8 sps:$4 sm:$0xff]   ;;  %v3951_v50 = vld [vmem:[#allocation5 + $0x190] ss:$8 sps:$4 sm:$0xff]   ;;  %v3981_v6 = vld [vmem:[#allocation5 + $0x1e0] ss:$8 sps:$4 sm:$0xff]  }
  0xa0   :  { %v3962_v53 = vld [vmem:[#allocation5 + $0x6a4] ss:$8 sps:$4 sm:$0xff]  }
  0xa1   :  { %2496 = vmatpush1.bf16.msra.mxu1 %v3853_v34  ;;  %v118_v34 = vld [vmem:[#allocation2 + $0x18] sm:$0xff]  ;;  %v3986_v5 = vld [vmem:[#allocation5 + $0x6e4] ss:$8 sps:$4 sm:$0xff]  }
  0xa2   :  { %2701 = vmatpush1.bf16.msra.mxu0 %v3854_v35  ;;  %2497 = vmatprep.subr.bf16.mxu1 %v3855_v36  ;;  %v3933_v35 = vld [vmem:[#allocation5 + $0x160] ss:$8 sps:$4 sm:$0xff]   ;;  %v142_v36 = vpack.c.bf16 %v118_v34, %v118_v34  ;;  %v4011_v34 = vld [vmem:[#allocation5 + $0x230] ss:$8 sps:$4 sm:$0xff]  }
  0xa3   :  { %2702 = vmatprep.subr.bf16.mxu0 %v3857_v37  ;;  %v3936_v37 = vld [vmem:[#allocation5 + $0x660] ss:$8 sps:$4 sm:$0xff]  }
  0xa5   :  { %2498 = vmatpush1.bf16.msra.mxu1 %v3859_v38  ;;  %v128_v38 = vld [vmem:[#allocation2 + $0x68] sm:$0xff] }
  0xa6   :  { %2703 = vmatpush1.bf16.msra.mxu0 %v3860_v39  ;;  %2499 = vmatprep.subr.bf16.mxu1 %v3861_v40  ;;  %v3941_v39 = vld [vmem:[#allocation5 + $0x174] ss:$8 sps:$4 sm:$0xff]  }
  0xa7   :  { %2704 = vmatprep.subr.bf16.mxu0 %v3863_v41  ;;  %v3944_v40 = vld [vmem:[#allocation5 + $0x674] ss:$8 sps:$4 sm:$0xff]   ;;  %v152_v41 = vpack.c.bf16 %v128_v38, %v128_v38  ;;  %v4017_v38 = vld [vmem:[#allocation5 + $0x240] ss:$8 sps:$4 sm:$0xff]  }
  0xa9   :  { %2500 = vmatpush1.bf16.msra.mxu1 %v3865_v42  ;;  %v3939_v42 = vld [vmem:[#allocation5 + $0x170] ss:$8 sps:$4 sm:$0xff]  }
  0xaa   :  { %2705 = vmatpush1.bf16.msra.mxu0 %v3866_v43  ;;  %2501 = vmatprep.subr.bf16.mxu1 %v3867_v44  ;;  %v3942_v43 = vld [vmem:[#allocation5 + $0x670] ss:$8 sps:$4 sm:$0xff]   ;;  %v3947_v44 = vld [vmem:[#allocation5 + $0x184] ss:$8 sps:$4 sm:$0xff]  }
  0xab   :  { %2706 = vmatprep.subr.bf16.mxu0 %v3869_v45  ;;  %v3950_v45 = vld [vmem:[#allocation5 + $0x684] ss:$8 sps:$4 sm:$0xff]  }
  0xad   :  { %2502 = vmatpush1.bf16.msra.mxu1 %v3871_v47  ;;  %v3948_v47 = vld [vmem:[#allocation5 + $0x680] ss:$8 sps:$4 sm:$0xff]  }
  0xae   :  { %2707 = vmatpush1.bf16.msra.mxu0 %v3872_v49  ;;  %2503 = vmatprep.subr.bf16.mxu1 %v3873_v51  ;;  %v3956_v49 = vld [vmem:[#allocation5 + $0x694] ss:$8 sps:$4 sm:$0xff]   ;;  %v3954_v51 = vld [vmem:[#allocation5 + $0x690] ss:$8 sps:$4 sm:$0xff]  }
  0xaf   :  { %2708 = vmatprep.subr.bf16.mxu0 %v3875_v52  ;;  %v3959_v52 = vld [vmem:[#allocation5 + $0x1a4] ss:$8 sps:$4 sm:$0xff]  }
  0xb1   :  { %2504 = vmatpush1.bf16.msra.mxu1 %v3877_v54  ;;  %v3957_v54 = vld [vmem:[#allocation5 + $0x1a0] ss:$8 sps:$4 sm:$0xff]  }
  0xb2   :  { %2709 = vmatpush1.bf16.msra.mxu0 %v3878_v55  ;;  %2505 = vmatprep.subr.bf16.mxu1 %v3879_v56  ;;  %v3960_v55 = vld [vmem:[#allocation5 + $0x6a0] ss:$8 sps:$4 sm:$0xff]   ;;  %v3965_v56 = vld [vmem:[#allocation5 + $0x1b4] ss:$8 sps:$4 sm:$0xff]  }
  0xb3   :  { %2710 = vmatprep.subr.bf16.mxu0 %v3881_v57  ;;  %v3968_v57 = vld [vmem:[#allocation5 + $0x6b4] ss:$8 sps:$4 sm:$0xff]  }
  0xb5   :  { %2506 = vmatpush1.bf16.msra.mxu1 %v3883_v58  ;;  %v3963_v58 = vld [vmem:[#allocation5 + $0x1b0] ss:$8 sps:$4 sm:$0xff]  }
  0xb6   :  { %2711 = vmatpush1.bf16.msra.mxu0 %v3884_v59  ;;  %2507 = vmatprep.subr.bf16.mxu1 %v3885_v60  ;;  %v3966_v59 = vld [vmem:[#allocation5 + $0x6b0] ss:$8 sps:$4 sm:$0xff]   ;;  %v3971_v60 = vld [vmem:[#allocation5 + $0x1c4] ss:$8 sps:$4 sm:$0xff]  }
  0xb7   :  { %2712 = vmatprep.subr.bf16.mxu0 %v3887_v61  ;;  %v3974_v61 = vld [vmem:[#allocation5 + $0x6c4] ss:$8 sps:$4 sm:$0xff]  }
  0xb9   :  { %2508 = vmatpush1.bf16.msra.mxu1 %v3889_v62  ;;  %v3969_v62 = vld [vmem:[#allocation5 + $0x1c0] ss:$8 sps:$4 sm:$0xff]  }
  0xba   :  { %2713 = vmatpush1.bf16.msra.mxu0 %v3890_v63  ;;  %2509 = vmatprep.subr.bf16.mxu1 %v3891_v0  ;;  %v3972_v63 = vld [vmem:[#allocation5 + $0x6c0] ss:$8 sps:$4 sm:$0xff]   ;;  %v3977_v0 = vld [vmem:[#allocation5 + $0x1d4] ss:$8 sps:$4 sm:$0xff]  }
  0xbb   :  { %2714 = vmatprep.subr.bf16.mxu0 %v3893_v1  ;;  %v3980_v1 = vld [vmem:[#allocation5 + $0x6d4] ss:$8 sps:$4 sm:$0xff]  }
  0xbd   :  { %2510 = vmatpush1.bf16.msra.mxu1 %v3895_v2  ;;  %v3975_v2 = vld [vmem:[#allocation5 + $0x1d0] ss:$8 sps:$4 sm:$0xff]  }
  0xbe   :  { %2715 = vmatpush1.bf16.msra.mxu0 %v3896_v3  ;;  %2520 = vmatprep.subr.bf16.mxu1 %v3899_v4  ;;  %v3978_v3 = vld [vmem:[#allocation5 + $0x6d0] ss:$8 sps:$4 sm:$0xff]   ;;  %v3983_v4 = vld [vmem:[#allocation5 + $0x1e4] ss:$8 sps:$4 sm:$0xff]  }
  0xbf   :  { %2725 = vmatprep.subr.bf16.mxu0 %v3902_v7  ;;  %v3984_v7 = vld [vmem:[#allocation5 + $0x6e0] ss:$8 sps:$4 sm:$0xff]  }
  0xc0   :  { %2512 = vmatmul.mubr.bf16.vlgmr.msra.gmra.mrb[0].mxu1 %v139_v10  ;;  %v3987_v10 = vld [vmem:[#allocation5 + $0x1f0] ss:$8 sps:$4 sm:$0xff]  }
  0xc1   :  { %2717 = vmatmul.mubr.bf16.vlgmr.msra.gmra.mrb[0].mxu0 %v149_v11  ;;  %2521 = vmatpush1.bf16.msra.mxu1 %v3897_v8  ;;  %v3989_v8 = vld [vmem:[#allocation5 + $0x1f4] ss:$8 sps:$4 sm:$0xff]   ;;  %v3990_v11 = vld [vmem:[#allocation5 + $0x6f0] ss:$8 sps:$4 sm:$0xff]  }
  0xc2   :  { %2726 = vmatpush1.bf16.msra.mxu0 %v3900_v9  ;;  %2522 = vmatprep.subr.bf16.mxu1 %v3905_v12  ;;  %v3992_v9 = vld [vmem:[#allocation5 + $0x6f4] ss:$8 sps:$4 sm:$0xff]   ;;  %v3995_v12 = vld [vmem:[#allocation5 + $0x204] ss:$8 sps:$4 sm:$0xff]  }
  0xc3   :  { %2727 = vmatprep.subr.bf16.mxu0 %v3908_v13  ;;  %2552 = vmatprep.mubr.bf16.mxu1 %v142_v36  ;;  %v117_v13 = vld [vmem:[#allocation2 + $0x10] sm:$0xff]  ;;  %v4019_v36 = vld [vmem:[#allocation5 + $0x244] ss:$8 sps:$4 sm:$0xff]  }
  0xc4   :  { %2757 = vmatprep.mubr.bf16.mxu0 %v152_v41  ;;  %v4028_v41 = vld [vmem:[#allocation5 + $0x754] ss:$8 sps:$4 sm:$0xff]  }
  0xc5   :  { %2523 = vmatpush1.bf16.msra.mxu1 %v3903_v14  ;;  %v127_v14 = vld [vmem:[#allocation2 + $0x60] sm:$0xff] }
  0xc6   :  { %2728 = vmatpush1.bf16.msra.mxu0 %v3906_v15  ;;  %2524 = vmatprep.subr.bf16.mxu1 %v3911_v16  ;;  %v3998_v15 = vld [vmem:[#allocation5 + $0x704] ss:$8 sps:$4 sm:$0xff]   ;;  %v3993_v16 = vld [vmem:[#allocation5 + $0x200] ss:$8 sps:$4 sm:$0xff]  }
  0xc7   :  { %2729 = vmatprep.subr.bf16.mxu0 %v3914_v17  ;;  %v3996_v17 = vld [vmem:[#allocation5 + $0x700] ss:$8 sps:$4 sm:$0xff]  }
  0xc9   :  { %2525 = vmatpush1.bf16.msra.mxu1 %v3909_v18  ;;  %v141_v18 = vpack.c.bf16 %v117_v13, %v117_v13  ;;  %v4082_v13 = vld [vmem:[#allocation5 + $0x7e4] ss:$8 sps:$4 sm:$0xff]  }
  0xca   :  { %2730 = vmatpush1.bf16.msra.mxu0 %v3912_v19  ;;  %2526 = vmatprep.subr.bf16.mxu1 %v3917_v20  ;;  %v151_v19 = vpack.c.bf16 %v127_v14, %v127_v14  ;;  %v4001_v20 = vld [vmem:[#allocation5 + $0x214] ss:$8 sps:$4 sm:$0xff]   ;;  %v4077_v14 = vld [vmem:[#allocation5 + $0x2e0] ss:$8 sps:$4 sm:$0xff]  }
  0xcb   :  { %2731 = vmatprep.subr.bf16.mxu0 %v3920_v21  ;;  %v4004_v21 = vld [vmem:[#allocation5 + $0x714] ss:$8 sps:$4 sm:$0xff]  }
  0xcd   :  { %2527 = vmatpush1.bf16.msra.mxu1 %v3915_v22  ;;  %v120_v22 = vld [vmem:[#allocation2 + $0x28] sm:$0xff] }
  0xce   :  { %2732 = vmatpush1.bf16.msra.mxu0 %v3918_v23  ;;  %2528 = vmatprep.subr.bf16.mxu1 %v3923_v24  ;;  %v3999_v23 = vld [vmem:[#allocation5 + $0x210] ss:$8 sps:$4 sm:$0xff]   ;;  %v144_v24 = vpack.c.bf16 %v120_v22, %v120_v22 }
  0xcf   :  { %2733 = vmatprep.subr.bf16.mxu0 %v3926_v25  ;;  %v4002_v25 = vld [vmem:[#allocation5 + $0x710] ss:$8 sps:$4 sm:$0xff]  }
  0xd0   :  { %v129_v22 = vld [vmem:[#allocation2 + $0x70] sm:$0xff] }
  0xd1   :  { %2529 = vmatpush1.bf16.msra.mxu1 %v3921_v26  ;;  %v130_v26 = vld [vmem:[#allocation2 + $0x78] sm:$0xff] }
  0xd2   :  { %2734 = vmatpush1.bf16.msra.mxu0 %v3924_v27  ;;  %2530 = vmatprep.subr.bf16.mxu1 %v3929_v28  ;;  %v4007_v27 = vld [vmem:[#allocation5 + $0x224] ss:$8 sps:$4 sm:$0xff]  }
  0xd3   :  { %2735 = vmatprep.subr.bf16.mxu0 %v3932_v29  ;;  %v4010_v28 = vld [vmem:[#allocation5 + $0x724] ss:$8 sps:$4 sm:$0xff]   ;;  %v154_v29 = vpack.c.bf16 %v130_v26, %v130_v26 }
  0xd5   :  { %2531 = vmatpush1.bf16.msra.mxu1 %v3927_v30  ;;  %v4005_v30 = vld [vmem:[#allocation5 + $0x220] ss:$8 sps:$4 sm:$0xff]  }
  0xd6   :  { %2736 = vmatpush1.bf16.msra.mxu0 %v3930_v31  ;;  %2532 = vmatprep.subr.bf16.mxu1 %v3935_v32  ;;  %v4008_v31 = vld [vmem:[#allocation5 + $0x720] ss:$8 sps:$4 sm:$0xff]   ;;  %v4013_v32 = vld [vmem:[#allocation5 + $0x234] ss:$8 sps:$4 sm:$0xff]  }
  0xd7   :  { %2737 = vmatprep.subr.bf16.mxu0 %v3938_v33  ;;  %v4016_v33 = vld [vmem:[#allocation5 + $0x734] ss:$8 sps:$4 sm:$0xff]  }
  0xd9   :  { %2533 = vmatpush1.bf16.msra.mxu1 %v3933_v35  ;;  %v4014_v35 = vld [vmem:[#allocation5 + $0x730] ss:$8 sps:$4 sm:$0xff]  }
  0xda   :  { %2738 = vmatpush1.bf16.msra.mxu0 %v3936_v37  ;;  %2534 = vmatprep.subr.bf16.mxu1 %v3941_v39  ;;  %v4022_v37 = vld [vmem:[#allocation5 + $0x744] ss:$8 sps:$4 sm:$0xff]   ;;  %v4020_v39 = vld [vmem:[#allocation5 + $0x740] ss:$8 sps:$4 sm:$0xff]  }
  0xdb   :  { %2739 = vmatprep.subr.bf16.mxu0 %v3944_v40  ;;  %v4025_v40 = vld [vmem:[#allocation5 + $0x254] ss:$8 sps:$4 sm:$0xff]  }
  0xdd   :  { %2535 = vmatpush1.bf16.msra.mxu1 %v3939_v42  ;;  %v4023_v42 = vld [vmem:[#allocation5 + $0x250] ss:$8 sps:$4 sm:$0xff]  }
  0xde   :  { %2740 = vmatpush1.bf16.msra.mxu0 %v3942_v43  ;;  %2536 = vmatprep.subr.bf16.mxu1 %v3947_v44  ;;  %v4026_v43 = vld [vmem:[#allocation5 + $0x750] ss:$8 sps:$4 sm:$0xff]   ;;  %v4031_v44 = vld [vmem:[#allocation5 + $0x264] ss:$8 sps:$4 sm:$0xff]  }
  0xdf   :  { %2741 = vmatprep.subr.bf16.mxu0 %v3950_v45  ;;  %v4034_v45 = vld [vmem:[#allocation5 + $0x764] ss:$8 sps:$4 sm:$0xff]  }
  0xe1   :  { %2537 = vmatpush1.bf16.msra.mxu1 %v3945_v46  ;;  %v4029_v46 = vld [vmem:[#allocation5 + $0x260] ss:$8 sps:$4 sm:$0xff]  }
  0xe2   :  { %2742 = vmatpush1.bf16.msra.mxu0 %v3948_v47  ;;  %2538 = vmatprep.subr.bf16.mxu1 %v3953_v48  ;;  %v4032_v47 = vld [vmem:[#allocation5 + $0x760] ss:$8 sps:$4 sm:$0xff]   ;;  %v4037_v48 = vld [vmem:[#allocation5 + $0x274] ss:$8 sps:$4 sm:$0xff]  }
  0xe3   :  { %2743 = vmatprep.subr.bf16.mxu0 %v3956_v49  ;;  %v4040_v49 = vld [vmem:[#allocation5 + $0x774] ss:$8 sps:$4 sm:$0xff]  }
  0xe5   :  { %2539 = vmatpush1.bf16.msra.mxu1 %v3951_v50  ;;  %v4035_v50 = vld [vmem:[#allocation5 + $0x270] ss:$8 sps:$4 sm:$0xff]  }
  0xe6   :  { %2744 = vmatpush1.bf16.msra.mxu0 %v3954_v51  ;;  %2540 = vmatprep.subr.bf16.mxu1 %v3959_v52  ;;  %v4038_v51 = vld [vmem:[#allocation5 + $0x770] ss:$8 sps:$4 sm:$0xff]   ;;  %v4043_v52 = vld [vmem:[#allocation5 + $0x284] ss:$8 sps:$4 sm:$0xff]  }
  0xe7   :  { %2745 = vmatprep.subr.bf16.mxu0 %v3962_v53  ;;  %v4046_v53 = vld [vmem:[#allocation5 + $0x784] ss:$8 sps:$4 sm:$0xff]  }
  0xe9   :  { %2541 = vmatpush1.bf16.msra.mxu1 %v3957_v54  ;;  %v4041_v54 = vld [vmem:[#allocation5 + $0x280] ss:$8 sps:$4 sm:$0xff]  }
  0xea   :  { %2746 = vmatpush1.bf16.msra.mxu0 %v3960_v55  ;;  %2542 = vmatprep.subr.bf16.mxu1 %v3965_v56  ;;  %v4044_v55 = vld [vmem:[#allocation5 + $0x780] ss:$8 sps:$4 sm:$0xff]   ;;  %v4049_v56 = vld [vmem:[#allocation5 + $0x294] ss:$8 sps:$4 sm:$0xff]  }
  0xeb   :  { %2747 = vmatprep.subr.bf16.mxu0 %v3968_v57  ;;  %v4052_v57 = vld [vmem:[#allocation5 + $0x794] ss:$8 sps:$4 sm:$0xff]  }
  0xed   :  { %2543 = vmatpush1.bf16.msra.mxu1 %v3963_v58  ;;  %v4047_v58 = vld [vmem:[#allocation5 + $0x290] ss:$8 sps:$4 sm:$0xff]  }
  0xee   :  { %2748 = vmatpush1.bf16.msra.mxu0 %v3966_v59  ;;  %2544 = vmatprep.subr.bf16.mxu1 %v3971_v60  ;;  %v4050_v59 = vld [vmem:[#allocation5 + $0x790] ss:$8 sps:$4 sm:$0xff]   ;;  %v4055_v60 = vld [vmem:[#allocation5 + $0x2a4] ss:$8 sps:$4 sm:$0xff]  }
  0xef   :  { %2749 = vmatprep.subr.bf16.mxu0 %v3974_v61  ;;  %v4058_v61 = vld [vmem:[#allocation5 + $0x7a4] ss:$8 sps:$4 sm:$0xff]  }
  0xf1   :  { %2545 = vmatpush1.bf16.msra.mxu1 %v3969_v62  ;;  %v4053_v62 = vld [vmem:[#allocation5 + $0x2a0] ss:$8 sps:$4 sm:$0xff]  }
  0xf2   :  { %2750 = vmatpush1.bf16.msra.mxu0 %v3972_v63  ;;  %2546 = vmatprep.subr.bf16.mxu1 %v3977_v0  ;;  %v4056_v63 = vld [vmem:[#allocation5 + $0x7a0] ss:$8 sps:$4 sm:$0xff]   ;;  %v4061_v0 = vld [vmem:[#allocation5 + $0x2b4] ss:$8 sps:$4 sm:$0xff]  }
  0xf3   :  { %2751 = vmatprep.subr.bf16.mxu0 %v3980_v1  ;;  %v4064_v1 = vld [vmem:[#allocation5 + $0x7b4] ss:$8 sps:$4 sm:$0xff]  }
  0xf5   :  { %2547 = vmatpush1.bf16.msra.mxu1 %v3975_v2  ;;  %v4059_v2 = vld [vmem:[#allocation5 + $0x2b0] ss:$8 sps:$4 sm:$0xff]  }
  0xf6   :  { %2752 = vmatpush1.bf16.msra.mxu0 %v3978_v3  ;;  %2548 = vmatprep.subr.bf16.mxu1 %v3983_v4  ;;  %v4062_v3 = vld [vmem:[#allocation5 + $0x7b0] ss:$8 sps:$4 sm:$0xff]   ;;  %v4067_v4 = vld [vmem:[#allocation5 + $0x2c4] ss:$8 sps:$4 sm:$0xff]  }
  0xf7   :  { %2753 = vmatprep.subr.bf16.mxu0 %v3986_v5  ;;  %v4070_v5 = vld [vmem:[#allocation5 + $0x7c4] ss:$8 sps:$4 sm:$0xff]  }
  0xf9   :  { %2549 = vmatpush1.bf16.msra.mxu1 %v3981_v6  ;;  %v4065_v6 = vld [vmem:[#allocation5 + $0x2c0] ss:$8 sps:$4 sm:$0xff]  }
  0xfa   :  { %2754 = vmatpush1.bf16.msra.mxu0 %v3984_v7  ;;  %2550 = vmatprep.subr.bf16.mxu1 %v3989_v8  ;;  %v4068_v7 = vld [vmem:[#allocation5 + $0x7c0] ss:$8 sps:$4 sm:$0xff]   ;;  %v4073_v8 = vld [vmem:[#allocation5 + $0x2d4] ss:$8 sps:$4 sm:$0xff]  }
  0xfb   :  { %2755 = vmatprep.subr.bf16.mxu0 %v3992_v9  ;;  %v4076_v9 = vld [vmem:[#allocation5 + $0x7d4] ss:$8 sps:$4 sm:$0xff]  }
  0xfd   :  { %2551 = vmatpush1.bf16.msra.mxu1 %v3987_v10  ;;  %v4071_v10 = vld [vmem:[#allocation5 + $0x2d0] ss:$8 sps:$4 sm:$0xff]  }
  0xfe   :  { %2756 = vmatpush1.bf16.msra.mxu0 %v3990_v11  ;;  %2561 = vmatprep.subr.bf16.mxu1 %v3995_v12  ;;  %v4074_v11 = vld [vmem:[#allocation5 + $0x7d0] ss:$8 sps:$4 sm:$0xff]   ;;  %v4079_v12 = vld [vmem:[#allocation5 + $0x2e4] ss:$8 sps:$4 sm:$0xff]  }
  0xff   :  { %2766 = vmatprep.subr.bf16.mxu0 %v3998_v15  ;;  %v4080_v15 = vld [vmem:[#allocation5 + $0x7e0] ss:$8 sps:$4 sm:$0xff]  }
 0x100   :  { %2553 = vmatmul.mubr.bf16.vlgmr.msra.gmra.mrb[0].mxu1 %v141_v18  ;;  %v4083_v18 = vld [vmem:[#allocation5 + $0x2f0] ss:$8 sps:$4 sm:$0xff]  }
 0x101   :  { %2758 = vmatmul.mubr.bf16.vlgmr.msra.gmra.mrb[0].mxu0 %v151_v19  ;;  %2562 = vmatpush1.bf16.msra.mxu1 %v3993_v16  ;;  %v4085_v16 = vld [vmem:[#allocation5 + $0x2f4] ss:$8 sps:$4 sm:$0xff]   ;;  %v4086_v19 = vld [vmem:[#allocation5 + $0x7f0] ss:$8 sps:$4 sm:$0xff]  }
 0x102   :  { %2767 = vmatpush1.bf16.msra.mxu0 %v3996_v17  ;;  %2563 = vmatprep.subr.bf16.mxu1 %v4001_v20  ;;  %v4088_v17 = vld [vmem:[#allocation5 + $0x7f4] ss:$8 sps:$4 sm:$0xff]   ;;  %v4091_v20 = vld [vmem:[#allocation5 + $0x304] ss:$8 sps:$4 sm:$0xff]  }
 0x103   :  { %2768 = vmatprep.subr.bf16.mxu0 %v4004_v21  ;;  %2593 = vmatprep.mubr.bf16.mxu1 %v144_v24  ;;  %v119_v21 = vld [vmem:[#allocation2 + $0x20] sm:$0xff] }
 0x104   :  { %2798 = vmatprep.mubr.bf16.mxu0 %v154_v29  ;;  %v4089_v24 = vld [vmem:[#allocation5 + $0x300] ss:$8 sps:$4 sm:$0xff]   ;;  %v143_v26 = vpack.c.bf16 %v119_v21, %v119_v21  ;;  %v4178_v21 = vld [vmem:[#allocation5 + $0x8e4] ss:$8 sps:$4 sm:$0xff]  }
 0x105   :  { %2564 = vmatpush1.bf16.msra.mxu1 %v3999_v23  ;;  %v4094_v23 = vld [vmem:[#allocation5 + $0x804] ss:$8 sps:$4 sm:$0xff]  }
 0x106   :  { %2769 = vmatpush1.bf16.msra.mxu0 %v4002_v25  ;;  %2565 = vmatprep.subr.bf16.mxu1 %v4007_v27  ;;  %v4092_v25 = vld [vmem:[#allocation5 + $0x800] ss:$8 sps:$4 sm:$0xff]   ;;  %v153_v27 = vpack.c.bf16 %v129_v22, %v129_v22 }
 0x107   :  { %2770 = vmatprep.subr.bf16.mxu0 %v4010_v28  ;;  %v122_v28 = vld [vmem:[#allocation2 + $0x38] sm:$0xff]  ;;  %v132_v29 = vld [vmem:[#allocation2 + $0x88] sm:$0xff] }
 0x108   :  { %v4173_v22 = vld [vmem:[#allocation5 + $0x3e0] ss:$8 sps:$4 sm:$0xff]  }
 0x109   :  { %2566 = vmatpush1.bf16.msra.mxu1 %v4005_v30  ;;  %v4097_v30 = vld [vmem:[#allocation5 + $0x314] ss:$8 sps:$4 sm:$0xff]  }
 0x10a   :  { %2771 = vmatpush1.bf16.msra.mxu0 %v4008_v31  ;;  %2567 = vmatprep.subr.bf16.mxu1 %v4013_v32  ;;  %v4100_v31 = vld [vmem:[#allocation5 + $0x814] ss:$8 sps:$4 sm:$0xff]   ;;  %v146_v32 = vpack.c.bf16 %v122_v28, %v122_v28  ;;  %v4187_v28 = vld [vmem:[#allocation5 + $0x404] ss:$8 sps:$4 sm:$0xff]  }
 0x10b   :  { %2772 = vmatprep.subr.bf16.mxu0 %v4016_v33  ;;  %v156_v33 = vpack.c.bf16 %v132_v29, %v132_v29  ;;  %v4190_v29 = vld [vmem:[#allocation5 + $0x904] ss:$8 sps:$4 sm:$0xff]  }
 0x10d   :  { %2568 = vmatpush1.bf16.msra.mxu1 %v4011_v34  ;;  %v4095_v34 = vld [vmem:[#allocation5 + $0x310] ss:$8 sps:$4 sm:$0xff]  }
 0x10e   :  { %2773 = vmatpush1.bf16.msra.mxu0 %v4014_v35  ;;  %2569 = vmatprep.subr.bf16.mxu1 %v4019_v36  ;;  %v4098_v35 = vld [vmem:[#allocation5 + $0x810] ss:$8 sps:$4 sm:$0xff]   ;;  %v4103_v36 = vld [vmem:[#allocation5 + $0x324] ss:$8 sps:$4 sm:$0xff]  }
 0x10f   :  { %2774 = vmatprep.subr.bf16.mxu0 %v4022_v37  ;;  %v4106_v37 = vld [vmem:[#allocation5 + $0x824] ss:$8 sps:$4 sm:$0xff]  }
 0x111   :  { %2570 = vmatpush1.bf16.msra.mxu1 %v4017_v38  ;;  %v4101_v38 = vld [vmem:[#allocation5 + $0x320] ss:$8 sps:$4 sm:$0xff]  }
 0x112   :  { %2775 = vmatpush1.bf16.msra.mxu0 %v4020_v39  ;;  %2571 = vmatprep.subr.bf16.mxu1 %v4025_v40  ;;  %v4104_v39 = vld [vmem:[#allocation5 + $0x820] ss:$8 sps:$4 sm:$0xff]   ;;  %v4109_v40 = vld [vmem:[#allocation5 + $0x334] ss:$8 sps:$4 sm:$0xff]  }
 0x113   :  { %2776 = vmatprep.subr.bf16.mxu0 %v4028_v41  ;;  %v4112_v41 = vld [vmem:[#allocation5 + $0x834] ss:$8 sps:$4 sm:$0xff]  }
 0x115   :  { %2572 = vmatpush1.bf16.msra.mxu1 %v4023_v42  ;;  %v4107_v42 = vld [vmem:[#allocation5 + $0x330] ss:$8 sps:$4 sm:$0xff]  }
 0x116   :  { %2777 = vmatpush1.bf16.msra.mxu0 %v4026_v43  ;;  %2573 = vmatprep.subr.bf16.mxu1 %v4031_v44  ;;  %v4110_v43 = vld [vmem:[#allocation5 + $0x830] ss:$8 sps:$4 sm:$0xff]   ;;  %v4115_v44 = vld [vmem:[#allocation5 + $0x344] ss:$8 sps:$4 sm:$0xff]  }
 0x117   :  { %2778 = vmatprep.subr.bf16.mxu0 %v4034_v45  ;;  %v4118_v45 = vld [vmem:[#allocation5 + $0x844] ss:$8 sps:$4 sm:$0xff]  }
 0x119   :  { %2574 = vmatpush1.bf16.msra.mxu1 %v4029_v46  ;;  %v4113_v46 = vld [vmem:[#allocation5 + $0x340] ss:$8 sps:$4 sm:$0xff]  }
 0x11a   :  { %2779 = vmatpush1.bf16.msra.mxu0 %v4032_v47  ;;  %2575 = vmatprep.subr.bf16.mxu1 %v4037_v48  ;;  %v4116_v47 = vld [vmem:[#allocation5 + $0x840] ss:$8 sps:$4 sm:$0xff]   ;;  %v4121_v48 = vld [vmem:[#allocation5 + $0x354] ss:$8 sps:$4 sm:$0xff]  }
 0x11b   :  { %2780 = vmatprep.subr.bf16.mxu0 %v4040_v49  ;;  %v4124_v49 = vld [vmem:[#allocation5 + $0x854] ss:$8 sps:$4 sm:$0xff]  }
 0x11d   :  { %2576 = vmatpush1.bf16.msra.mxu1 %v4035_v50  ;;  %v4119_v50 = vld [vmem:[#allocation5 + $0x350] ss:$8 sps:$4 sm:$0xff]  }
 0x11e   :  { %2781 = vmatpush1.bf16.msra.mxu0 %v4038_v51  ;;  %2577 = vmatprep.subr.bf16.mxu1 %v4043_v52  ;;  %v4122_v51 = vld [vmem:[#allocation5 + $0x850] ss:$8 sps:$4 sm:$0xff]   ;;  %v4127_v52 = vld [vmem:[#allocation5 + $0x364] ss:$8 sps:$4 sm:$0xff]  }
 0x11f   :  { %2782 = vmatprep.subr.bf16.mxu0 %v4046_v53  ;;  %v4130_v53 = vld [vmem:[#allocation5 + $0x864] ss:$8 sps:$4 sm:$0xff]  }
 0x121   :  { %2578 = vmatpush1.bf16.msra.mxu1 %v4041_v54  ;;  %v4125_v54 = vld [vmem:[#allocation5 + $0x360] ss:$8 sps:$4 sm:$0xff]  }
 0x122   :  { %2783 = vmatpush1.bf16.msra.mxu0 %v4044_v55  ;;  %2579 = vmatprep.subr.bf16.mxu1 %v4049_v56  ;;  %v4128_v55 = vld [vmem:[#allocation5 + $0x860] ss:$8 sps:$4 sm:$0xff]   ;;  %v4133_v56 = vld [vmem:[#allocation5 + $0x374] ss:$8 sps:$4 sm:$0xff]  }
 0x123   :  { %2784 = vmatprep.subr.bf16.mxu0 %v4052_v57  ;;  %v4136_v57 = vld [vmem:[#allocation5 + $0x874] ss:$8 sps:$4 sm:$0xff]  }
 0x125   :  { %2580 = vmatpush1.bf16.msra.mxu1 %v4047_v58  ;;  %v4131_v58 = vld [vmem:[#allocation5 + $0x370] ss:$8 sps:$4 sm:$0xff]  }
 0x126   :  { %2785 = vmatpush1.bf16.msra.mxu0 %v4050_v59  ;;  %2581 = vmatprep.subr.bf16.mxu1 %v4055_v60  ;;  %v4134_v59 = vld [vmem:[#allocation5 + $0x870] ss:$8 sps:$4 sm:$0xff]   ;;  %v4139_v60 = vld [vmem:[#allocation5 + $0x384] ss:$8 sps:$4 sm:$0xff]  }
 0x127   :  { %2786 = vmatprep.subr.bf16.mxu0 %v4058_v61  ;;  %v4142_v61 = vld [vmem:[#allocation5 + $0x884] ss:$8 sps:$4 sm:$0xff]  }
 0x129   :  { %2582 = vmatpush1.bf16.msra.mxu1 %v4053_v62  ;;  %v4137_v62 = vld [vmem:[#allocation5 + $0x380] ss:$8 sps:$4 sm:$0xff]  }
 0x12a   :  { %2787 = vmatpush1.bf16.msra.mxu0 %v4056_v63  ;;  %2583 = vmatprep.subr.bf16.mxu1 %v4061_v0  ;;  %v4140_v63 = vld [vmem:[#allocation5 + $0x880] ss:$8 sps:$4 sm:$0xff]   ;;  %v4145_v0 = vld [vmem:[#allocation5 + $0x394] ss:$8 sps:$4 sm:$0xff]  }
 0x12b   :  { %2788 = vmatprep.subr.bf16.mxu0 %v4064_v1  ;;  %v4148_v1 = vld [vmem:[#allocation5 + $0x894] ss:$8 sps:$4 sm:$0xff]  }
 0x12d   :  { %2584 = vmatpush1.bf16.msra.mxu1 %v4059_v2  ;;  %v4143_v2 = vld [vmem:[#allocation5 + $0x390] ss:$8 sps:$4 sm:$0xff]  }
 0x12e   :  { %2789 = vmatpush1.bf16.msra.mxu0 %v4062_v3  ;;  %2585 = vmatprep.subr.bf16.mxu1 %v4067_v4  ;;  %v4146_v3 = vld [vmem:[#allocation5 + $0x890] ss:$8 sps:$4 sm:$0xff]   ;;  %v4151_v4 = vld [vmem:[#allocation5 + $0x3a4] ss:$8 sps:$4 sm:$0xff]  }
 0x12f   :  { %2790 = vmatprep.subr.bf16.mxu0 %v4070_v5  ;;  %v4154_v5 = vld [vmem:[#allocation5 + $0x8a4] ss:$8 sps:$4 sm:$0xff]  }
 0x131   :  { %2586 = vmatpush1.bf16.msra.mxu1 %v4065_v6  ;;  %v4149_v6 = vld [vmem:[#allocation5 + $0x3a0] ss:$8 sps:$4 sm:$0xff]  }
 0x132   :  { %2791 = vmatpush1.bf16.msra.mxu0 %v4068_v7  ;;  %2587 = vmatprep.subr.bf16.mxu1 %v4073_v8  ;;  %v4152_v7 = vld [vmem:[#allocation5 + $0x8a0] ss:$8 sps:$4 sm:$0xff]   ;;  %v4157_v8 = vld [vmem:[#allocation5 + $0x3b4] ss:$8 sps:$4 sm:$0xff]  }
 0x133   :  { %2792 = vmatprep.subr.bf16.mxu0 %v4076_v9  ;;  %v4160_v9 = vld [vmem:[#allocation5 + $0x8b4] ss:$8 sps:$4 sm:$0xff]  }
 0x135   :  { %2588 = vmatpush1.bf16.msra.mxu1 %v4071_v10  ;;  %v4155_v10 = vld [vmem:[#allocation5 + $0x3b0] ss:$8 sps:$4 sm:$0xff]  }
 0x136   :  { %2793 = vmatpush1.bf16.msra.mxu0 %v4074_v11  ;;  %2589 = vmatprep.subr.bf16.mxu1 %v4079_v12  ;;  %v4158_v11 = vld [vmem:[#allocation5 + $0x8b0] ss:$8 sps:$4 sm:$0xff]   ;;  %v4163_v12 = vld [vmem:[#allocation5 + $0x3c4] ss:$8 sps:$4 sm:$0xff]  }
 0x137   :  { %2794 = vmatprep.subr.bf16.mxu0 %v4082_v13  ;;  %v4166_v13 = vld [vmem:[#allocation5 + $0x8c4] ss:$8 sps:$4 sm:$0xff]  }
 0x139   :  { %2590 = vmatpush1.bf16.msra.mxu1 %v4077_v14  ;;  %v4161_v14 = vld [vmem:[#allocation5 + $0x3c0] ss:$8 sps:$4 sm:$0xff]  }
 0x13a   :  { %2795 = vmatpush1.bf16.msra.mxu0 %v4080_v15  ;;  %2591 = vmatprep.subr.bf16.mxu1 %v4085_v16  ;;  %v4164_v15 = vld [vmem:[#allocation5 + $0x8c0] ss:$8 sps:$4 sm:$0xff]   ;;  %v4169_v16 = vld [vmem:[#allocation5 + $0x3d4] ss:$8 sps:$4 sm:$0xff]  }
 0x13b   :  { %2796 = vmatprep.subr.bf16.mxu0 %v4088_v17  ;;  %v4172_v17 = vld [vmem:[#allocation5 + $0x8d4] ss:$8 sps:$4 sm:$0xff]  }
 0x13d   :  { %2592 = vmatpush1.bf16.msra.mxu1 %v4083_v18  ;;  %v4167_v18 = vld [vmem:[#allocation5 + $0x3d0] ss:$8 sps:$4 sm:$0xff]  }
 0x13e   :  { %2797 = vmatpush1.bf16.msra.mxu0 %v4086_v19  ;;  %2602 = vmatprep.subr.bf16.mxu1 %v4091_v20  ;;  %v4170_v19 = vld [vmem:[#allocation5 + $0x8d0] ss:$8 sps:$4 sm:$0xff]   ;;  %v4175_v20 = vld [vmem:[#allocation5 + $0x3e4] ss:$8 sps:$4 sm:$0xff]  }
 0x13f   :  { %2807 = vmatprep.subr.bf16.mxu0 %v4094_v23  ;;  %v4176_v23 = vld [vmem:[#allocation5 + $0x8e0] ss:$8 sps:$4 sm:$0xff]  }
 0x140   :  { %2594 = vmatmul.mubr.bf16.vlgmr.msra.gmra.mrb[0].mxu1 %v143_v26  ;;  %v4179_v26 = vld [vmem:[#allocation5 + $0x3f0] ss:$8 sps:$4 sm:$0xff]  }
 0x141   :  { %2799 = vmatmul.mubr.bf16.vlgmr.msra.gmra.mrb[0].mxu0 %v153_v27  ;;  %2603 = vmatpush1.bf16.msra.mxu1 %v4089_v24  ;;  %v4181_v24 = vld [vmem:[#allocation5 + $0x3f4] ss:$8 sps:$4 sm:$0xff]   ;;  %v4182_v27 = vld [vmem:[#allocation5 + $0x8f0] ss:$8 sps:$4 sm:$0xff]  }
 0x142   :  { %2808 = vmatpush1.bf16.msra.mxu0 %v4092_v25  ;;  %2604 = vmatprep.subr.bf16.mxu1 %v4097_v30  ;;  %v4184_v25 = vld [vmem:[#allocation5 + $0x8f4] ss:$8 sps:$4 sm:$0xff]  }
 0x143   :  { %2809 = vmatprep.subr.bf16.mxu0 %v4100_v31  ;;  %2634 = vmatprep.mubr.bf16.mxu1 %v146_v32  ;;  %v121_v30 = vld [vmem:[#allocation2 + $0x30] sm:$0xff]  ;;  %v131_v31 = vld [vmem:[#allocation2 + $0x80] sm:$0xff]  ;;  %v124_v32 = vld [vmem:[#allocation2 + $0x48] sm:$0xff] }
 0x144   :  { %2839 = vmatprep.mubr.bf16.mxu0 %v156_v33  ;;  %v134_v33 = vld [vmem:[#allocation2 + $0x98] sm:$0xff] }
 0x145   :  { %2605 = vmatpush1.bf16.msra.mxu1 %v4095_v34  ;;  %v145_v34 = vpack.c.bf16 %v121_v30, %v121_v30  ;;  %v4269_v30 = vld [vmem:[#allocation5 + $0x4e0] ss:$8 sps:$4 sm:$0xff]  }
 0x146   :  { %2810 = vmatpush1.bf16.msra.mxu0 %v4098_v35  ;;  %2606 = vmatprep.subr.bf16.mxu1 %v4103_v36  ;;  %v155_v35 = vpack.c.bf16 %v131_v31, %v131_v31  ;;  %v4185_v36 = vld [vmem:[#allocation5 + $0x400] ss:$8 sps:$4 sm:$0xff]  }
 0x147   :  { %2811 = vmatprep.subr.bf16.mxu0 %v4106_v37  ;;  %v4188_v37 = vld [vmem:[#allocation5 + $0x900] ss:$8 sps:$4 sm:$0xff]  }
 0x148   :  { %v4272_v31 = vld [vmem:[#allocation5 + $0x9e0] ss:$8 sps:$4 sm:$0xff]  }
 0x149   :  { %2607 = vmatpush1.bf16.msra.mxu1 %v4101_v38  ;;  %v4193_v38 = vld [vmem:[#allocation5 + $0x414] ss:$8 sps:$4 sm:$0xff]  }
 0x14a   :  { %2812 = vmatpush1.bf16.msra.mxu0 %v4104_v39  ;;  %2608 = vmatprep.subr.bf16.mxu1 %v4109_v40  ;;  %v4196_v39 = vld [vmem:[#allocation5 + $0x914] ss:$8 sps:$4 sm:$0xff]   ;;  %v4191_v40 = vld [vmem:[#allocation5 + $0x410] ss:$8 sps:$4 sm:$0xff]  }
 0x14b   :  { %2813 = vmatprep.subr.bf16.mxu0 %v4112_v41  ;;  %v4194_v41 = vld [vmem:[#allocation5 + $0x910] ss:$8 sps:$4 sm:$0xff]  }
 0x14d   :  { %2609 = vmatpush1.bf16.msra.mxu1 %v4107_v42  ;;  %v148_v42 = vpack.c.bf16 %v124_v32, %v124_v32  ;;  %v4277_v32 = vld [vmem:[#allocation5 + $0x4f4] ss:$8 sps:$4 sm:$0xff]  }
 0x14e   :  { %2814 = vmatpush1.bf16.msra.mxu0 %v4110_v43  ;;  %2610 = vmatprep.subr.bf16.mxu1 %v4115_v44  ;;  %v158_v43 = vpack.c.bf16 %v134_v33, %v134_v33  ;;  %v4199_v44 = vld [vmem:[#allocation5 + $0x424] ss:$8 sps:$4 sm:$0xff]   ;;  %v4280_v33 = vld [vmem:[#allocation5 + $0x9f4] ss:$8 sps:$4 sm:$0xff]  }
 0x14f   :  { %2815 = vmatprep.subr.bf16.mxu0 %v4118_v45  ;;  %v4202_v45 = vld [vmem:[#allocation5 + $0x924] ss:$8 sps:$4 sm:$0xff]  }
 0x151   :  { %2611 = vmatpush1.bf16.msra.mxu1 %v4113_v46  ;;  %v4197_v46 = vld [vmem:[#allocation5 + $0x420] ss:$8 sps:$4 sm:$0xff]  }
 0x152   :  { %2816 = vmatpush1.bf16.msra.mxu0 %v4116_v47  ;;  %2612 = vmatprep.subr.bf16.mxu1 %v4121_v48  ;;  %v4200_v47 = vld [vmem:[#allocation5 + $0x920] ss:$8 sps:$4 sm:$0xff]   ;;  %v4205_v48 = vld [vmem:[#allocation5 + $0x434] ss:$8 sps:$4 sm:$0xff]  }
 0x153   :  { %2817 = vmatprep.subr.bf16.mxu0 %v4124_v49  ;;  %v4208_v49 = vld [vmem:[#allocation5 + $0x934] ss:$8 sps:$4 sm:$0xff]  }
 0x155   :  { %2613 = vmatpush1.bf16.msra.mxu1 %v4119_v50  ;;  %v4203_v50 = vld [vmem:[#allocation5 + $0x430] ss:$8 sps:$4 sm:$0xff]  }
 0x156   :  { %2818 = vmatpush1.bf16.msra.mxu0 %v4122_v51  ;;  %2614 = vmatprep.subr.bf16.mxu1 %v4127_v52  ;;  %v4206_v51 = vld [vmem:[#allocation5 + $0x930] ss:$8 sps:$4 sm:$0xff]   ;;  %v4211_v52 = vld [vmem:[#allocation5 + $0x444] ss:$8 sps:$4 sm:$0xff]  }
 0x157   :  { %2819 = vmatprep.subr.bf16.mxu0 %v4130_v53  ;;  %v4214_v53 = vld [vmem:[#allocation5 + $0x944] ss:$8 sps:$4 sm:$0xff]  }
 0x159   :  { %2615 = vmatpush1.bf16.msra.mxu1 %v4125_v54  ;;  %v4209_v54 = vld [vmem:[#allocation5 + $0x440] ss:$8 sps:$4 sm:$0xff]  }
 0x15a   :  { %2820 = vmatpush1.bf16.msra.mxu0 %v4128_v55  ;;  %2616 = vmatprep.subr.bf16.mxu1 %v4133_v56  ;;  %v4212_v55 = vld [vmem:[#allocation5 + $0x940] ss:$8 sps:$4 sm:$0xff]   ;;  %v4217_v56 = vld [vmem:[#allocation5 + $0x454] ss:$8 sps:$4 sm:$0xff]  }
 0x15b   :  { %2821 = vmatprep.subr.bf16.mxu0 %v4136_v57  ;;  %v4220_v57 = vld [vmem:[#allocation5 + $0x954] ss:$8 sps:$4 sm:$0xff]  }
 0x15d   :  { %2617 = vmatpush1.bf16.msra.mxu1 %v4131_v58  ;;  %v4215_v58 = vld [vmem:[#allocation5 + $0x450] ss:$8 sps:$4 sm:$0xff]  }
 0x15e   :  { %2822 = vmatpush1.bf16.msra.mxu0 %v4134_v59  ;;  %2618 = vmatprep.subr.bf16.mxu1 %v4139_v60  ;;  %v4218_v59 = vld [vmem:[#allocation5 + $0x950] ss:$8 sps:$4 sm:$0xff]   ;;  %v4223_v60 = vld [vmem:[#allocation5 + $0x464] ss:$8 sps:$4 sm:$0xff]  }
 0x15f   :  { %2823 = vmatprep.subr.bf16.mxu0 %v4142_v61  ;;  %v4226_v61 = vld [vmem:[#allocation5 + $0x964] ss:$8 sps:$4 sm:$0xff]  }
 0x161   :  { %2619 = vmatpush1.bf16.msra.mxu1 %v4137_v62  ;;  %v4221_v62 = vld [vmem:[#allocation5 + $0x460] ss:$8 sps:$4 sm:$0xff]  }
 0x162   :  { %2824 = vmatpush1.bf16.msra.mxu0 %v4140_v63  ;;  %2620 = vmatprep.subr.bf16.mxu1 %v4145_v0  ;;  %v4224_v63 = vld [vmem:[#allocation5 + $0x960] ss:$8 sps:$4 sm:$0xff]   ;;  %v4229_v0 = vld [vmem:[#allocation5 + $0x474] ss:$8 sps:$4 sm:$0xff]  }
 0x163   :  { %2825 = vmatprep.subr.bf16.mxu0 %v4148_v1  ;;  %v4232_v1 = vld [vmem:[#allocation5 + $0x974] ss:$8 sps:$4 sm:$0xff]  }
 0x165   :  { %2621 = vmatpush1.bf16.msra.mxu1 %v4143_v2  ;;  %v4227_v2 = vld [vmem:[#allocation5 + $0x470] ss:$8 sps:$4 sm:$0xff]  }
 0x166   :  { %2826 = vmatpush1.bf16.msra.mxu0 %v4146_v3  ;;  %2622 = vmatprep.subr.bf16.mxu1 %v4151_v4  ;;  %v4230_v3 = vld [vmem:[#allocation5 + $0x970] ss:$8 sps:$4 sm:$0xff]   ;;  %v4235_v4 = vld [vmem:[#allocation5 + $0x484] ss:$8 sps:$4 sm:$0xff]  }
 0x167   :  { %2827 = vmatprep.subr.bf16.mxu0 %v4154_v5  ;;  %v4238_v5 = vld [vmem:[#allocation5 + $0x984] ss:$8 sps:$4 sm:$0xff]  }
 0x169   :  { %2623 = vmatpush1.bf16.msra.mxu1 %v4149_v6  ;;  %v4233_v6 = vld [vmem:[#allocation5 + $0x480] ss:$8 sps:$4 sm:$0xff]  }
 0x16a   :  { %2828 = vmatpush1.bf16.msra.mxu0 %v4152_v7  ;;  %2624 = vmatprep.subr.bf16.mxu1 %v4157_v8  ;;  %v4236_v7 = vld [vmem:[#allocation5 + $0x980] ss:$8 sps:$4 sm:$0xff]   ;;  %v4241_v8 = vld [vmem:[#allocation5 + $0x494] ss:$8 sps:$4 sm:$0xff]  }
 0x16b   :  { %2829 = vmatprep.subr.bf16.mxu0 %v4160_v9  ;;  %v4244_v9 = vld [vmem:[#allocation5 + $0x994] ss:$8 sps:$4 sm:$0xff]  }
 0x16d   :  { %2625 = vmatpush1.bf16.msra.mxu1 %v4155_v10  ;;  %v4239_v10 = vld [vmem:[#allocation5 + $0x490] ss:$8 sps:$4 sm:$0xff]  }
 0x16e   :  { %2830 = vmatpush1.bf16.msra.mxu0 %v4158_v11  ;;  %2626 = vmatprep.subr.bf16.mxu1 %v4163_v12  ;;  %v4242_v11 = vld [vmem:[#allocation5 + $0x990] ss:$8 sps:$4 sm:$0xff]   ;;  %v4247_v12 = vld [vmem:[#allocation5 + $0x4a4] ss:$8 sps:$4 sm:$0xff]  }
 0x16f   :  { %2831 = vmatprep.subr.bf16.mxu0 %v4166_v13  ;;  %v4250_v13 = vld [vmem:[#allocation5 + $0x9a4] ss:$8 sps:$4 sm:$0xff]  }
 0x171   :  { %2627 = vmatpush1.bf16.msra.mxu1 %v4161_v14  ;;  %v4245_v14 = vld [vmem:[#allocation5 + $0x4a0] ss:$8 sps:$4 sm:$0xff]  }
 0x172   :  { %2832 = vmatpush1.bf16.msra.mxu0 %v4164_v15  ;;  %2628 = vmatprep.subr.bf16.mxu1 %v4169_v16  ;;  %v4248_v15 = vld [vmem:[#allocation5 + $0x9a0] ss:$8 sps:$4 sm:$0xff]   ;;  %v4253_v16 = vld [vmem:[#allocation5 + $0x4b4] ss:$8 sps:$4 sm:$0xff]  }
 0x173   :  { %2833 = vmatprep.subr.bf16.mxu0 %v4172_v17  ;;  %v4256_v17 = vld [vmem:[#allocation5 + $0x9b4] ss:$8 sps:$4 sm:$0xff]  }
 0x175   :  { %2629 = vmatpush1.bf16.msra.mxu1 %v4167_v18  ;;  %v4251_v18 = vld [vmem:[#allocation5 + $0x4b0] ss:$8 sps:$4 sm:$0xff]  }
 0x176   :  { %2834 = vmatpush1.bf16.msra.mxu0 %v4170_v19  ;;  %2630 = vmatprep.subr.bf16.mxu1 %v4175_v20  ;;  %v4254_v19 = vld [vmem:[#allocation5 + $0x9b0] ss:$8 sps:$4 sm:$0xff]   ;;  %v4259_v20 = vld [vmem:[#allocation5 + $0x4c4] ss:$8 sps:$4 sm:$0xff]  }
 0x177   :  { %2835 = vmatprep.subr.bf16.mxu0 %v4178_v21  ;;  %v4262_v21 = vld [vmem:[#allocation5 + $0x9c4] ss:$8 sps:$4 sm:$0xff]  }
 0x179   :  { %2631 = vmatpush1.bf16.msra.mxu1 %v4173_v22  ;;  %v4257_v22 = vld [vmem:[#allocation5 + $0x4c0] ss:$8 sps:$4 sm:$0xff]  }
 0x17a   :  { %2836 = vmatpush1.bf16.msra.mxu0 %v4176_v23  ;;  %2632 = vmatprep.subr.bf16.mxu1 %v4181_v24  ;;  %v4260_v23 = vld [vmem:[#allocation5 + $0x9c0] ss:$8 sps:$4 sm:$0xff]   ;;  %v4265_v24 = vld [vmem:[#allocation5 + $0x4d4] ss:$8 sps:$4 sm:$0xff]  }
 0x17b   :  { %2837 = vmatprep.subr.bf16.mxu0 %v4184_v25  ;;  %v4268_v25 = vld [vmem:[#allocation5 + $0x9d4] ss:$8 sps:$4 sm:$0xff]  }
 0x17d   :  { %2633 = vmatpush1.bf16.msra.mxu1 %v4179_v26  ;;  %v4263_v26 = vld [vmem:[#allocation5 + $0x4d0] ss:$8 sps:$4 sm:$0xff]  }
 0x17e   :  { %2838 = vmatpush1.bf16.msra.mxu0 %v4182_v27  ;;  %2643 = vmatprep.subr.bf16.mxu1 %v4187_v28  ;;  %v4266_v27 = vld [vmem:[#allocation5 + $0x9d0] ss:$8 sps:$4 sm:$0xff]   ;;  %v4271_v28 = vld [vmem:[#allocation5 + $0x4e4] ss:$8 sps:$4 sm:$0xff]  }
 0x17f   :  { %2848 = vmatprep.subr.bf16.mxu0 %v4190_v29  ;;  %v4274_v29 = vld [vmem:[#allocation5 + $0x9e4] ss:$8 sps:$4 sm:$0xff]  }
 0x180   :  { %2635 = vmatmul.mubr.bf16.vlgmr.msra.gmra.mrb[0].mxu1 %v145_v34  ;;  %v4275_v34 = vld [vmem:[#allocation5 + $0x4f0] ss:$8 sps:$4 sm:$0xff]  }
 0x181   :  { %2840 = vmatmul.mubr.bf16.vlgmr.msra.gmra.mrb[0].mxu0 %v155_v35  ;;  %2644 = vmatpush1.bf16.msra.mxu1 %v4185_v36  ;;  %v4278_v35 = vld [vmem:[#allocation5 + $0x9f0] ss:$8 sps:$4 sm:$0xff]   ;;  %v123_v36 = vld [vmem:[#allocation2 + $0x40] sm:$0xff] }
 0x182   :  { %2849 = vmatpush1.bf16.msra.mxu0 %v4188_v37  ;;  %2645 = vmatprep.subr.bf16.mxu1 %v4193_v38  ;;  %v133_v37 = vld [vmem:[#allocation2 + $0x90] sm:$0xff]  ;;  %v4283_v38 = vld [vmem:[#allocation5 + $0xa04] ss:$8 sps:$4 sm:$0xff]  }
 0x183   :  { %2850 = vmatprep.subr.bf16.mxu0 %v4196_v39  ;;  %2675 = vmatprep.mubr.bf16.mxu1 %v148_v42  ;;  %v136_v39 = vld [vmem:[#allocation2 + $0xa8] sm:$0xff] }
 0x184   :  { %2880 = vmatprep.mubr.bf16.mxu0 %v158_v43  ;;  %v4281_v42 = vld [vmem:[#allocation5 + $0xa00] ss:$8 sps:$4 sm:$0xff]   ;;  %v160_v43 = vpack.c.bf16 %v136_v39, %v136_v39 }
 0x185   :  { %2646 = vmatpush1.bf16.msra.mxu1 %v4191_v40  ;;  %v147_v40 = vpack.c.bf16 %v123_v36, %v123_v36  ;;  %v4353_v36 = vld [vmem:[#allocation5 + $0xb80] ss:$8 sps:$4 sm:$0xff]  }
 0x186   :  { %2851 = vmatpush1.bf16.msra.mxu0 %v4194_v41  ;;  %2647 = vmatprep.subr.bf16.mxu1 %v4199_v44  ;;  %v157_v41 = vpack.c.bf16 %v133_v37, %v133_v37  ;;  %v4286_v44 = vld [vmem:[#allocation5 + $0xa14] ss:$8 sps:$4 sm:$0xff]  }
 0x187   :  { %2852 = vmatprep.subr.bf16.mxu0 %v4202_v45  ;;  %v4284_v45 = vld [vmem:[#allocation5 + $0xa10] ss:$8 sps:$4 sm:$0xff]  }
 0x188   :  { %v4382_v37 = vld [vmem:[#allocation8 + $0x10] sm:$0xff]   ;;  %v4383_v39 = vld [vmem:[#allocation8 + $0x58] sm:$0xff]  }
 0x189   :  { %2648 = vmatpush1.bf16.msra.mxu1 %v4197_v46  ;;  %v4289_v46 = vld [vmem:[#allocation5 + $0xa24] ss:$8 sps:$4 sm:$0xff]  }
 0x18a   :  { %2853 = vmatpush1.bf16.msra.mxu0 %v4200_v47  ;;  %2649 = vmatprep.subr.bf16.mxu1 %v4205_v48  ;;  %v4287_v47 = vld [vmem:[#allocation5 + $0xa20] ss:$8 sps:$4 sm:$0xff]   ;;  %v4292_v48 = vld [vmem:[#allocation5 + $0xa34] ss:$8 sps:$4 sm:$0xff]  }
 0x18b   :  { %2854 = vmatprep.subr.bf16.mxu0 %v4208_v49  ;;  %v4290_v49 = vld [vmem:[#allocation5 + $0xa30] ss:$8 sps:$4 sm:$0xff]  }
 0x18d   :  { %2650 = vmatpush1.bf16.msra.mxu1 %v4203_v50  ;;  %v4295_v50 = vld [vmem:[#allocation5 + $0xa44] ss:$8 sps:$4 sm:$0xff]  }
 0x18e   :  { %2855 = vmatpush1.bf16.msra.mxu0 %v4206_v51  ;;  %2651 = vmatprep.subr.bf16.mxu1 %v4211_v52  ;;  %v4293_v51 = vld [vmem:[#allocation5 + $0xa40] ss:$8 sps:$4 sm:$0xff]   ;;  %v4298_v52 = vld [vmem:[#allocation5 + $0xa54] ss:$8 sps:$4 sm:$0xff]  }
 0x18f   :  { %2856 = vmatprep.subr.bf16.mxu0 %v4214_v53  ;;  %v4296_v53 = vld [vmem:[#allocation5 + $0xa50] ss:$8 sps:$4 sm:$0xff]  }
 0x191   :  { %2652 = vmatpush1.bf16.msra.mxu1 %v4209_v54  ;;  %v4301_v54 = vld [vmem:[#allocation5 + $0xa64] ss:$8 sps:$4 sm:$0xff]  }
 0x192   :  { %2857 = vmatpush1.bf16.msra.mxu0 %v4212_v55  ;;  %2653 = vmatprep.subr.bf16.mxu1 %v4217_v56  ;;  %v4299_v55 = vld [vmem:[#allocation5 + $0xa60] ss:$8 sps:$4 sm:$0xff]   ;;  %v4304_v56 = vld [vmem:[#allocation5 + $0xa74] ss:$8 sps:$4 sm:$0xff]  }
 0x193   :  { %2858 = vmatprep.subr.bf16.mxu0 %v4220_v57  ;;  %v4302_v57 = vld [vmem:[#allocation5 + $0xa70] ss:$8 sps:$4 sm:$0xff]  }
 0x195   :  { %2654 = vmatpush1.bf16.msra.mxu1 %v4215_v58  ;;  %v4307_v58 = vld [vmem:[#allocation5 + $0xa84] ss:$8 sps:$4 sm:$0xff]  }
 0x196   :  { %2859 = vmatpush1.bf16.msra.mxu0 %v4218_v59  ;;  %2655 = vmatprep.subr.bf16.mxu1 %v4223_v60  ;;  %v4305_v59 = vld [vmem:[#allocation5 + $0xa80] ss:$8 sps:$4 sm:$0xff]   ;;  %v4310_v60 = vld [vmem:[#allocation5 + $0xa94] ss:$8 sps:$4 sm:$0xff]  }
 0x197   :  { %2860 = vmatprep.subr.bf16.mxu0 %v4226_v61  ;;  %v4308_v61 = vld [vmem:[#allocation5 + $0xa90] ss:$8 sps:$4 sm:$0xff]  }
 0x199   :  { %2656 = vmatpush1.bf16.msra.mxu1 %v4221_v62  ;;  %v4313_v62 = vld [vmem:[#allocation5 + $0xaa4] ss:$8 sps:$4 sm:$0xff]  }
 0x19a   :  { %2861 = vmatpush1.bf16.msra.mxu0 %v4224_v63  ;;  %2657 = vmatprep.subr.bf16.mxu1 %v4229_v0  ;;  %v4311_v63 = vld [vmem:[#allocation5 + $0xaa0] ss:$8 sps:$4 sm:$0xff]   ;;  %v4316_v0 = vld [vmem:[#allocation5 + $0xab4] ss:$8 sps:$4 sm:$0xff]  }
 0x19b   :  { %2862 = vmatprep.subr.bf16.mxu0 %v4232_v1  ;;  %v4314_v1 = vld [vmem:[#allocation5 + $0xab0] ss:$8 sps:$4 sm:$0xff]  }
 0x19d   :  { %2658 = vmatpush1.bf16.msra.mxu1 %v4227_v2  ;;  %v4319_v2 = vld [vmem:[#allocation5 + $0xac4] ss:$8 sps:$4 sm:$0xff]  }
 0x19e   :  { %2863 = vmatpush1.bf16.msra.mxu0 %v4230_v3  ;;  %2659 = vmatprep.subr.bf16.mxu1 %v4235_v4  ;;  %v4317_v3 = vld [vmem:[#allocation5 + $0xac0] ss:$8 sps:$4 sm:$0xff]   ;;  %v4322_v4 = vld [vmem:[#allocation5 + $0xad4] ss:$8 sps:$4 sm:$0xff]  }
 0x19f   :  { %2864 = vmatprep.subr.bf16.mxu0 %v4238_v5  ;;  %v4320_v5 = vld [vmem:[#allocation5 + $0xad0] ss:$8 sps:$4 sm:$0xff]  }
 0x1a1   :  { %2660 = vmatpush1.bf16.msra.mxu1 %v4233_v6  ;;  %v4325_v6 = vld [vmem:[#allocation5 + $0xae4] ss:$8 sps:$4 sm:$0xff]  }
 0x1a2   :  { %2865 = vmatpush1.bf16.msra.mxu0 %v4236_v7  ;;  %2661 = vmatprep.subr.bf16.mxu1 %v4241_v8  ;;  %v4323_v7 = vld [vmem:[#allocation5 + $0xae0] ss:$8 sps:$4 sm:$0xff]   ;;  %v4328_v8 = vld [vmem:[#allocation5 + $0xaf4] ss:$8 sps:$4 sm:$0xff]  }
 0x1a3   :  { %2866 = vmatprep.subr.bf16.mxu0 %v4244_v9  ;;  %v4326_v9 = vld [vmem:[#allocation5 + $0xaf0] ss:$8 sps:$4 sm:$0xff]  }
 0x1a5   :  { %2662 = vmatpush1.bf16.msra.mxu1 %v4239_v10  ;;  %v135_v10 = vld [vmem:[#allocation2 + $0xa0] sm:$0xff] }
 0x1a6   :  { %2867 = vmatpush1.bf16.msra.mxu0 %v4242_v11  ;;  %2663 = vmatprep.subr.bf16.mxu1 %v4247_v12  ;;  %v4331_v11 = vld [vmem:[#allocation5 + $0xb04] ss:$8 sps:$4 sm:$0xff]   ;;  %v138_v12 = vld [vmem:[#allocation2 + $0xb8] sm:$0xff] }
 0x1a7   :  { %2868 = vmatprep.subr.bf16.mxu0 %v4250_v13  ;;  %v159_v13 = vpack.c.bf16 %v135_v10, %v135_v10 }
 0x1a9   :  { %2664 = vmatpush1.bf16.msra.mxu1 %v4245_v14  ;;  %v4329_v14 = vld [vmem:[#allocation5 + $0xb00] ss:$8 sps:$4 sm:$0xff]  }
 0x1aa   :  { %2869 = vmatpush1.bf16.msra.mxu0 %v4248_v15  ;;  %2665 = vmatprep.subr.bf16.mxu1 %v4253_v16  ;;  %v162_v15 = vpack.c.bf16 %v138_v12, %v138_v12  ;;  %v4334_v16 = vld [vmem:[#allocation5 + $0xb14] ss:$8 sps:$4 sm:$0xff]  }
 0x1ab   :  { %2870 = vmatprep.subr.bf16.mxu0 %v4256_v17  ;;  %v4332_v17 = vld [vmem:[#allocation5 + $0xb10] ss:$8 sps:$4 sm:$0xff]  }
 0x1ad   :  { %2666 = vmatpush1.bf16.msra.mxu1 %v4251_v18  ;;  %v4337_v18 = vld [vmem:[#allocation5 + $0xb24] ss:$8 sps:$4 sm:$0xff]  }
 0x1ae   :  { %2871 = vmatpush1.bf16.msra.mxu0 %v4254_v19  ;;  %2667 = vmatprep.subr.bf16.mxu1 %v4259_v20  ;;  %v4335_v19 = vld [vmem:[#allocation5 + $0xb20] ss:$8 sps:$4 sm:$0xff]   ;;  %v4340_v20 = vld [vmem:[#allocation5 + $0xb34] ss:$8 sps:$4 sm:$0xff]  }
 0x1af   :  { %2872 = vmatprep.subr.bf16.mxu0 %v4262_v21  ;;  %v4338_v21 = vld [vmem:[#allocation5 + $0xb30] ss:$8 sps:$4 sm:$0xff]  }
 0x1b1   :  { %2668 = vmatpush1.bf16.msra.mxu1 %v4257_v22  ;;  %v4343_v22 = vld [vmem:[#allocation5 + $0xb44] ss:$8 sps:$4 sm:$0xff]  }
 0x1b2   :  { %2873 = vmatpush1.bf16.msra.mxu0 %v4260_v23  ;;  %2669 = vmatprep.subr.bf16.mxu1 %v4265_v24  ;;  %v4341_v23 = vld [vmem:[#allocation5 + $0xb40] ss:$8 sps:$4 sm:$0xff]   ;;  %v4346_v24 = vld [vmem:[#allocation5 + $0xb54] ss:$8 sps:$4 sm:$0xff]  }
 0x1b3   :  { %2874 = vmatprep.subr.bf16.mxu0 %v4268_v25  ;;  %v4344_v25 = vld [vmem:[#allocation5 + $0xb50] ss:$8 sps:$4 sm:$0xff]  }
 0x1b5   :  { %2670 = vmatpush1.bf16.msra.mxu1 %v4263_v26  ;;  %v4349_v26 = vld [vmem:[#allocation5 + $0xb64] ss:$8 sps:$4 sm:$0xff]  }
 0x1b6   :  { %2875 = vmatpush1.bf16.msra.mxu0 %v4266_v27  ;;  %2671 = vmatprep.subr.bf16.mxu1 %v4271_v28  ;;  %v4347_v27 = vld [vmem:[#allocation5 + $0xb60] ss:$8 sps:$4 sm:$0xff]   ;;  %v4352_v28 = vld [vmem:[#allocation5 + $0xb74] ss:$8 sps:$4 sm:$0xff]  }
 0x1b7   :  { %2876 = vmatprep.subr.bf16.mxu0 %v4274_v29  ;;  %v4377_v29 = vld [vmem:[#allocation8 + $0x40] sm:$0xff]  }
 0x1b9   :  { %2672 = vmatpush1.bf16.msra.mxu1 %v4269_v30  ;;  %v4378_v30 = vld [vmem:[#allocation8] sm:$0xff]  }
 0x1ba   :  { %2877 = vmatpush1.bf16.msra.mxu0 %v4272_v31  ;;  %2673 = vmatprep.subr.bf16.mxu1 %v4277_v32  ;;  %v4379_v31 = vld [vmem:[#allocation8 + $0x48] sm:$0xff]  }
 0x1bb   :  { %2878 = vmatprep.subr.bf16.mxu0 %v4280_v33  ;;  %v4350_v32 = vld [vmem:[#allocation5 + $0xb70] ss:$8 sps:$4 sm:$0xff]  }
 0x1bc   :  { %v4380_v33 = vld [vmem:[#allocation8 + $0x8] sm:$0xff]  }
 0x1bd   :  { %2674 = vmatpush1.bf16.msra.mxu1 %v4275_v34  ;;  %v4355_v34 = vld [vmem:[#allocation5 + $0xb84] ss:$8 sps:$4 sm:$0xff]  }
 0x1be   :  { %2879 = vmatpush1.bf16.msra.mxu0 %v4278_v35  ;;  %3692 = vmatprep.subr.bf16.mxu1 %v4377_v29  ;;  %v4381_v35 = vld [vmem:[#allocation8 + $0x50] sm:$0xff]  }
 0x1bf   :  { %2889 = vmatprep.subr.bf16.mxu0 %v4283_v38  ;;  %v4358_v38 = vld [vmem:[#allocation5 + $0xb94] ss:$8 sps:$4 sm:$0xff]   ;;  %v4398_v29 = vld [vmem:[#allocation11 + $0x28] sm:$0xff]  }
 0x1c0   :  { %2676 = vmatmul.mubr.bf16.vlgmr.msra.gmra.mrb[0].mxu1 %v147_v40  ;;  %v4356_v40 = vld [vmem:[#allocation5 + $0xb90] ss:$8 sps:$4 sm:$0xff]  }
 0x1c1   :  { %2881 = vmatmul.mubr.bf16.vlgmr.msra.gmra.mrb[0].mxu0 %v157_v41  ;;  %3693 = vmatpush3.bf16.msra.mxu1 %v4378_v30  ;;  %v4384_v41 = vld [vmem:[#allocation8 + $0x18] sm:$0xff]  }
 0x1c2   :  { %2890 = vmatpush1.bf16.msra.mxu0 %v4281_v42  ;;  %2921 = vmatprep.mubr.bf16.mxu0 %v160_v43  ;;  %v4361_v42 = vld [vmem:[#allocation5 + $0xba4] ss:$8 sps:$4 sm:$0xff]   ;;  %v4399_v30 = vld [vmem:[#allocation11 + $0x30] sm:$0xff]  }
 0x1c3   :  { %2891 = vmatprep.subr.bf16.mxu0 %v4286_v44  ;;  %3694 = vmatprep.subr.bf16.mxu1 %v4379_v31  ;;  %v4385_v43 = vld [vmem:[#allocation8 + $0x60] sm:$0xff]  }
 0x1c4   :  { %v4359_v44 = vld [vmem:[#allocation5 + $0xba0] ss:$8 sps:$4 sm:$0xff]  }
 0x1c5   :  { %3695 = vmatpush3.bf16.msra.mxu1 %v4380_v33  ;;  %v4400_v31 = vld [vmem:[#allocation11 + $0x38] sm:$0xff]  }
 0x1c6   :  { %2892 = vmatpush1.bf16.msra.mxu0 %v4284_v45  ;;  %3696 = vmatprep.subr.bf16.mxu1 %v4381_v35  ;;  %v4386_v45 = vld [vmem:[#allocation8 + $0x20] sm:$0xff]  }
 0x1c7   :  { %2893 = vmatprep.subr.bf16.mxu0 %v4289_v46  ;;  %v4364_v46 = vld [vmem:[#allocation5 + $0xbb4] ss:$8 sps:$4 sm:$0xff]   ;;  %v3666_v33 = vld [vmem:[#allocation10] ss:$0 sm:$0xff] }
 0x1c9   :  { %3697 = vmatpush3.bf16.msra.mxu1 %v4382_v37 }
 0x1ca   :  { %2894 = vmatpush1.bf16.msra.mxu0 %v4287_v47  ;;  %3698 = vmatprep.subr.bf16.mxu1 %v4383_v39  ;;  %v4387_v47 = vld [vmem:[#allocation8 + $0x68] sm:$0xff]  }
 0x1cb   :  { %2895 = vmatprep.subr.bf16.mxu0 %v4292_v48  ;;  %v4362_v48 = vld [vmem:[#allocation5 + $0xbb0] ss:$8 sps:$4 sm:$0xff]  }
 0x1cd   :  { %3699 = vmatpush3.bf16.msra.mxu1 %v4384_v41  ;;  %v3683_v41 = vld [vmem:[#allocation13] ss:$0 sm:$0xff] }
 0x1ce   :  { %2896 = vmatpush1.bf16.msra.mxu0 %v4290_v49  ;;  %3700 = vmatprep.subr.bf16.mxu1 %v4385_v43  ;;  %v4388_v49 = vld [vmem:[#allocation8 + $0x28] sm:$0xff]  }
 0x1cf   :  { %2897 = vmatprep.subr.bf16.mxu0 %v4295_v50  ;;  %v4367_v50 = vld [vmem:[#allocation5 + $0xbc4] ss:$8 sps:$4 sm:$0xff]  }
 0x1d1   :  { %3701 = vmatpush3.bf16.msra.mxu1 %v4386_v45 }
 0x1d2   :  { %2898 = vmatpush1.bf16.msra.mxu0 %v4293_v51  ;;  %3702 = vmatprep.subr.bf16.mxu1 %v4387_v47  ;;  %v4365_v51 = vld [vmem:[#allocation5 + $0xbc0] ss:$8 sps:$4 sm:$0xff]  }
 0x1d3   :  { %2899 = vmatprep.subr.bf16.mxu0 %v4298_v52  ;;  %v4370_v52 = vld [vmem:[#allocation5 + $0xbd4] ss:$8 sps:$4 sm:$0xff]  }
 0x1d5   :  { %3703 = vmatpush3.bf16.msra.mxu1 %v4388_v49 }
 0x1d6   :  { %2900 = vmatpush1.bf16.msra.mxu0 %v4296_v53  ;;  %v4368_v53 = vld [vmem:[#allocation5 + $0xbd0] ss:$8 sps:$4 sm:$0xff]  }
 0x1d7   :  { %2901 = vmatprep.subr.bf16.mxu0 %v4301_v54  ;;  %v4373_v54 = vld [vmem:[#allocation5 + $0xbe4] ss:$8 sps:$4 sm:$0xff]  }
 0x1da   :  { %2902 = vmatpush1.bf16.msra.mxu0 %v4299_v55  ;;  %v4371_v55 = vld [vmem:[#allocation5 + $0xbe0] ss:$8 sps:$4 sm:$0xff]  }
 0x1db   :  { %2903 = vmatprep.subr.bf16.mxu0 %v4304_v56  ;;  %v4376_v56 = vld [vmem:[#allocation5 + $0xbf4] ss:$8 sps:$4 sm:$0xff]  }
 0x1de   :  { %2904 = vmatpush1.bf16.msra.mxu0 %v4302_v57  ;;  %v4374_v57 = vld [vmem:[#allocation5 + $0xbf0] ss:$8 sps:$4 sm:$0xff]  }
 0x1df   :  { %2905 = vmatprep.subr.bf16.mxu0 %v4307_v58  ;;  %v137_v58 = vld [vmem:[#allocation2 + $0xb0] sm:$0xff] }
 0x1e2   :  { %2906 = vmatpush1.bf16.msra.mxu0 %v4305_v59  ;;  %v161_v59 = vpack.c.bf16 %v137_v58, %v137_v58 }
 0x1e3   :  { %2907 = vmatprep.subr.bf16.mxu0 %v4310_v60  ;;  %v4389_v60 = vld [vmem:[#allocation8 + $0x70] sm:$0xff]  }
 0x1e4   :  { %3704 = vmatprep.subr.bf16.mxu1 %v4389_v60 }
 0x1e6   :  { %2908 = vmatpush1.bf16.msra.mxu0 %v4308_v61 }
 0x1e7   :  { %2909 = vmatprep.subr.bf16.mxu0 %v4313_v62  ;;  %v4390_v62 = vld [vmem:[#allocation8 + $0x30] sm:$0xff]  }
 0x1e8   :  { %3705 = vmatpush3.bf16.msra.mxu1 %v4390_v62 }
 0x1ea   :  { %2910 = vmatpush1.bf16.msra.mxu0 %v4311_v63 }
 0x1eb   :  { %2911 = vmatprep.subr.bf16.mxu0 %v4316_v0 }
 0x1ee   :  { %2912 = vmatpush1.bf16.msra.mxu0 %v4314_v1 }
 0x1ef   :  { %2913 = vmatprep.subr.bf16.mxu0 %v4319_v2  ;;  %v4391_v2 = vld [vmem:[#allocation8 + $0x78] sm:$0xff]  }
 0x1f0   :  { %3706 = vmatprep.subr.bf16.mxu1 %v4391_v2 }
 0x1f2   :  { %2914 = vmatpush1.bf16.msra.mxu0 %v4317_v3  ;;  %v4392_v3 = vld [vmem:[#allocation8 + $0x38] sm:$0xff]  }
 0x1f3   :  { %2915 = vmatprep.subr.bf16.mxu0 %v4322_v4  ;;  %3707 = vmatpush3.bf16.msra.mxu1 %v4392_v3  ;;  %v4598_v4 = vmov 0.0  }
 0x1f4   :  { %3723 = vmatprep.subr.bf16.mxu1 %v4598_v4 }
 0x1f6   :  { %2916 = vmatpush1.bf16.msra.mxu0 %v4320_v5  ;;  %v549_v5 = vlaneseq }
 0x1f7   :  { %2917 = vmatprep.subr.bf16.mxu0 %v4325_v6 }
 0x1f8   :  { %v550_v6 = vshrl.u32 %v549_v5, 7 }
 0x1fa   :  { %2918 = vmatpush1.bf16.msra.mxu0 %v4323_v7  ;;  %v551_v7 = vsub.s32 0, %v550_v6 }
 0x1fb   :  { %2919 = vmatprep.subr.bf16.mxu0 %v4328_v8  ;;  %v547_v8 = vld [vmem:[#allocation7] sm:$0x3] }
 0x1fc   :  { %v552_v10 = vrot.slane %v547_v8, %v551_v7 }
 0x1fe   :  { %2920 = vmatpush1.bf16.msra.mxu0 %v4326_v9  ;;  %v555_v9 = vsub.s32 1, %v550_v6 }
 0x1ff   :  { %2930 = vmatprep.subr.bf16.mxu0 %v4331_v11 }
 0x200   :  { %v556_v11 = vrot.slane %v547_v8, %v555_v9 }
 0x201   :  { %2922 = vmatmul.mubr.bf16.vlgmr.msra.gmra.mrb[0].mxu0 %v159_v13 }
 0x202   :  { %2931 = vmatpush1.bf16.msra.mxu0 %v4329_v14  ;;  %2962 = vmatprep.mubr.bf16.mxu0 %v162_v15 }
 0x203   :  { %2932 = vmatprep.subr.bf16.mxu0 %v4334_v16 }
 0x206   :  { %2933 = vmatpush1.bf16.msra.mxu0 %v4332_v17 }
 0x207   :  { %2934 = vmatprep.subr.bf16.mxu0 %v4337_v18 }
 0x20a   :  { %2935 = vmatpush1.bf16.msra.mxu0 %v4335_v19 }
 0x20b   :  { %2936 = vmatprep.subr.bf16.mxu0 %v4340_v20 }
 0x20e   :  { %2937 = vmatpush1.bf16.msra.mxu0 %v4338_v21 }
 0x20f   :  { %2938 = vmatprep.subr.bf16.mxu0 %v4343_v22 }
 0x212   :  { %2939 = vmatpush1.bf16.msra.mxu0 %v4341_v23  ;;  %v4393_v23 = vld [vmem:[#allocation11] sm:$0xff]  }
 0x213   :  { %2940 = vmatprep.subr.bf16.mxu0 %v4346_v24 }
 0x216   :  { %2941 = vmatpush1.bf16.msra.mxu0 %v4344_v25  ;;  %v4394_v25 = vld [vmem:[#allocation11 + $0x8] sm:$0xff]  }
 0x217   :  { %2942 = vmatprep.subr.bf16.mxu0 %v4349_v26  ;;  %v4395_v26 = vld [vmem:[#allocation11 + $0x10] sm:$0xff]  }
 0x21a   :  { %2943 = vmatpush1.bf16.msra.mxu0 %v4347_v27  ;;  %v4396_v27 = vld [vmem:[#allocation11 + $0x18] sm:$0xff]  }
 0x21b   :  { %2944 = vmatprep.subr.bf16.mxu0 %v4352_v28  ;;  %v4397_v28 = vld [vmem:[#allocation11 + $0x20] sm:$0xff]  }
 0x21e   :  { %2945 = vmatpush1.bf16.msra.mxu0 %v4350_v32 }
 0x21f   :  { %2946 = vmatprep.subr.bf16.mxu0 %v4355_v34 }
 0x222   :  { %2947 = vmatpush1.bf16.msra.mxu0 %v4353_v36 }
 0x223   :  { %2948 = vmatprep.subr.bf16.mxu0 %v4358_v38 }
 0x226   :  { %2949 = vmatpush1.bf16.msra.mxu0 %v4356_v40 }
 0x227   :  { %2950 = vmatprep.subr.bf16.mxu0 %v4361_v42 }
 0x22a   :  { %2951 = vmatpush1.bf16.msra.mxu0 %v4359_v44 }
 0x22b   :  { %2952 = vmatprep.subr.bf16.mxu0 %v4364_v46 }
 0x22e   :  { %2953 = vmatpush1.bf16.msra.mxu0 %v4362_v48 }
 0x22f   :  { %2954 = vmatprep.subr.bf16.mxu0 %v4367_v50 }
 0x232   :  { %2955 = vmatpush1.bf16.msra.mxu0 %v4365_v51 }
 0x233   :  { %2956 = vmatprep.subr.bf16.mxu0 %v4370_v52 }
 0x236   :  { %2957 = vmatpush1.bf16.msra.mxu0 %v4368_v53 }
 0x237   :  { %2958 = vmatprep.subr.bf16.mxu0 %v4373_v54 }
 0x23a   :  { %2959 = vmatpush1.bf16.msra.mxu0 %v4371_v55 }
 0x23b   :  { %2960 = vmatprep.subr.bf16.mxu0 %v4376_v56 }
 0x23e   :  { %2961 = vmatpush1.bf16.msra.mxu0 %v4374_v57 }
 0x241   :  { %2963 = vmatmul.mubr.bf16.vlgmr.msra.gmra.mrb[0].mxu0 %v161_v59 }
 0x293   :  { %v2677_v61 = vpop.f32.mrb[0].mxu1 }
 0x294   :  { %v2679_v63 = vpop.f32.mrb[1].mxu1  ;;  %v3743_v12 = vadd.f32 %v2677_v61, %v552_v10 }
 0x295   :  { %v2681_v0 = vpop.f32.mrb[2].mxu1  ;;  %v3745_v13 = vadd.f32 %v2679_v63, %v556_v11 }
 0x296   :  { %v2682_v1 = vpop.f32.mrb[3].mxu1 }
 0x314   :  { %v2964_v14 = vpop.f32.mrb[0].mxu0 }
 0x315   :  { %v3744_v15 = vadd.f32 %v3743_v12, %v2964_v14  ;;  %v2966_v16 = vpop.f32.mrb[1].mxu0 }
 0x316   :  { %v3746_v17 = vadd.f32 %v3745_v13, %v2966_v16  ;;  %v2968_v18 = vpop.f32.mrb[2].mxu0 }
 0x317   :  { %v2971_v19 = vmax.f32 %v3744_v15, 0.0  ;;  %v2969_v20 = vpop.f32.mrb[3].mxu0 }
 0x318   :  { %v2972_v21 = vmax.f32 %v3746_v17, 0.0 }
 0x319   :  { %v2973_v24 = vpack.c.bf16 %v2971_v19, %v2971_v19 }
 0x31a   :  { %v2974_v22 = vpack.c.bf16 %v2972_v21, %v2972_v21 }
 0x31c   :  { %3142 = vmatprep.mubr.bf16.mxu1 %v2974_v22 }
 0x31d   :  { %3143 = vmatmul.mubr.bf16.vlgmr.msra.gmra.mrb[4].mxu1 %v2973_v24 }
 0x31e   :  { %3724 = vmatpush3.bf16.msra.mxu1 %v4393_v23  ;;  %3739 = vmatprep.mubr.msk.bf16.mxu1 %vm4599_vm0, %v4598_v4 }
 0x31f   :  { %3725 = vmatprep.subr.bf16.mxu1 %v4598_v4 }
 0x322   :  { %3726 = vmatpush3.bf16.msra.mxu1 %v4394_v25 }
 0x323   :  { %3727 = vmatprep.subr.bf16.mxu1 %v4598_v4 }
 0x326   :  { %3728 = vmatpush3.bf16.msra.mxu1 %v4395_v26 }
 0x327   :  { %3729 = vmatprep.subr.bf16.mxu1 %v4598_v4 }
 0x32a   :  { %3730 = vmatpush3.bf16.msra.mxu1 %v4396_v27 }
 0x32b   :  { %3731 = vmatprep.subr.bf16.mxu1 %v4598_v4 }
 0x32e   :  { %3732 = vmatpush3.bf16.msra.mxu1 %v4397_v28 }
 0x32f   :  { %3733 = vmatprep.subr.bf16.mxu1 %v4598_v4 }
 0x332   :  { %3734 = vmatpush3.bf16.msra.mxu1 %v4398_v29 }
 0x333   :  { %3735 = vmatprep.subr.bf16.mxu1 %v4598_v4 }
 0x336   :  { %3736 = vmatpush3.bf16.msra.mxu1 %v4399_v30 }
 0x337   :  { %3737 = vmatprep.subr.bf16.mxu1 %v4598_v4 }
 0x33a   :  { %3738 = vmatpush3.bf16.msra.mxu1 %v4400_v31 }
 0x3f0   :  { %v3708_v32 = vpop.f32.mrb[4].mxu1 }
 0x3f1   :  { %v3709_v34 = vpop.f32.mrb[5].mxu1 }
 0x3f2   :  { %v3710_v35 = vadd.f32 %v3709_v34, %v3708_v32  ;;  %v3711_v36 = vpop.f32.mrb[6].mxu1 }
 0x3f3   :  { %v3712_v37 = vpop.f32.mrb[7].mxu1 }
 0x3f4   :  { %v3145_v38 = vadd.f32 %v3710_v35, %v3666_v33 }
 0x3f6   :  { %v3150_v39 = vmax.f32 %v3145_v38, 0.0 }
 0x3f8   :  { %v3151_v40 = vpack.c.bf16 %v3150_v39, %v3150_v39 }
 0x3fa   :  { %3740 = vmatmul.mubr.bf16.vlgmr.msra.gmra.mrb[8].mxu1 %v3151_v40 }
 0x4cd   :  { %v3257_v42 = vpop.f32.mrb[8].mxu1 }
 0x4ce   :  { %v3258_v43 = vadd.f32 %v3683_v41, %v3257_v42  ;;  %v3741_v44 = vpop.f32.mrb[9].mxu1 }
 0x4cf   :  { %v3260_v45 = vpop.f32.mrb[10].mxu1 }
 0x4d0   :  { %3263 = vst [vmem:[#allocation14] sm:$0xff] %v3258_v43  ;;  %v3742_v46 = vpop.f32.mrb[11].mxu1 }
 0x4d1   :  { %4566 = shalt.err (!%p4563_p4)
}
 0x4d2   :  { %s4567_s15 = scalar_lea.hbm %s4744_s7, 128 }
 0x4d3   :  { %p4568_p5 = scmp.ne.s32.totalorder %s4744_s7, %s4567_s15  ;;  %p4571_p6 = scmp.lt.u32.totalorder %s4567_s15, %s4744_s7 }
 0x4d5   :  { %p4573_p7 = pnand %p4571_p6, %p4568_p5 }
 0x4d7   :  { %4576 = shalt.err (!%p4573_p7)
}
 0x4d8   :  { %3273 = dma.vmem_to_hbm [thread:$0]  %s3271_s13, 128, %s4744_s7, [#allocation4]  }
 0x4d9   :  { %4585 = dma.done.wait [#allocation4], 128  }
 0x4da   :  { %4586 = vsyncadd [#allocation4], 4294967168 }
 0x4db   :  { %3277 = vsyncpa [#allocation3], 1 }
 0x4dc   :  { %3278 = vsyncpa [#allocation6], 1 }
 0x4dd   :  { %3279 = vsyncpa [#allocation9], 1 }
 0x4de   :  { %3280 = vsyncpa [#allocation12], 1 }
 0x4df   :  { %3281 = vsyncpa [#allocation4], 1 }

</bundles_post_ra>
